<compile_context>
chip_gen: v7x
topology: tpu7x:2x2x1
jax: 0.10.0
libtpu: 0.0.40
codegen_flags: <defaults>
</compile_context>

<pallas_src>
import functools

import numpy as np
import jax
import jax.numpy as jnp
from jax.experimental import pallas as pl
from jax.experimental.pallas import tpu as pltpu

# Conv matmuls use bf16 operands on the MXU with f32 accumulation (v6e/v7x guidance).
# Set to jnp.float32 for exact-f32 semantics.
MATMUL_DTYPE = jnp.bfloat16
NEG_SLOPE = 0.01   # nn.LeakyReLU default
EPS = 1e-5         # nn.InstanceNorm2d default


# ----------------------------------------------------------------------------
# In-kernel fused Conv3x3(pad=1, no bias) + InstanceNorm2d(affine) + LeakyReLU
# ----------------------------------------------------------------------------
def _conv3x3_in_lrelu(x, w2d, gamma, beta, mask_l, mask_r, W):
    """x: (Cin, H*W) f32 (spatial on lanes); w2d: (Cout, 9*Cin) packed weights
    (row index = dy*3*Cin + dx*Cin + ci); gamma/beta: (Cout, 1);
    mask_l/mask_r: (1, H*W) border masks (0 where w==0 / w==W-1).
    Returns (Cout, H*W) f32."""
    cin, hw = x.shape

    # --- im2col: one (9*Cin, H*W) patch matrix built from cheap lane shifts ---
    zc = jnp.zeros((cin, 1), jnp.float32)
    xs0 = jnp.concatenate([zc, x[:, : hw - 1]], axis=1) * mask_l   # reads (h, w-1)
    xs2 = jnp.concatenate([x[:, 1:], zc], axis=1) * mask_r         # reads (h, w+1)
    xs = jnp.concatenate([xs0, x, xs2], axis=0)                    # (3*Cin, HW)
    zr = jnp.zeros((3 * cin, W), jnp.float32)
    top = jnp.concatenate([zr, xs[:, : hw - W]], axis=1)           # reads row h-1
    bot = jnp.concatenate([xs[:, W:], zr], axis=1)                 # reads row h+1
    patches = jnp.concatenate([top, xs, bot], axis=0)              # (9*Cin, HW)

    # --- single MXU matmul (bf16 operands, f32 accumulation) ---
    acc = jnp.dot(w2d, patches.astype(w2d.dtype),
                  preferred_element_type=jnp.float32)              # (Cout, HW)

    # --- InstanceNorm2d: per-channel (per-row) biased stats over H*W, affine ---
    mean = jnp.mean(acc, axis=1, keepdims=True)
    ctr = acc - mean
    var = jnp.mean(ctr * ctr, axis=1, keepdims=True)
    y = ctr * jax.lax.rsqrt(var + EPS) * gamma + beta

    # --- LeakyReLU (negative_slope = 0.01) ---
    return jnp.where(y >= 0.0, y, NEG_SLOPE * y)


def _encoder_layer_kernel(x_ref, w1_ref, g1_ref, b1_ref, w2_ref, g2_ref, b2_ref,
                          mask_ref, pool_ref, o1_ref, o2_ref, *, W):
    """One full encoder layer for one batch element, entirely in VMEM."""
    x = x_ref[0]                      # (Cin, H*W)
    mask_l = mask_ref[0:1, :]         # (1, H*W)
    mask_r = mask_ref[1:2, :]
    y1 = _conv3x3_in_lrelu(x, w1_ref[...], g1_ref[...], b1_ref[...],
                           mask_l, mask_r, W)
    y2 = _conv3x3_in_lrelu(y1, w2_ref[...], g2_ref[...], b2_ref[...],
                           mask_l, mask_r, W)
    # x1[:, :c//2] skip output straight from VMEM (no post-hoc HBM slice).
    c_half = o1_ref.shape[1]
    o1_ref[...] = y2[:c_half, :].reshape(o1_ref.shape)
    # F.avg_pool2d(x1, 2) as a single matmul with the host-built pooling matrix.
    o2_ref[...] = jnp.dot(y2, pool_ref[...],
                          preferred_element_type=jnp.float32).reshape(o2_ref.shape)


def encoder_layer(x_flat, tab, H, W):
    """x_flat: (B, Cin, H*W) f32.
    Returns (x1_half: (B, Cout//2, H*W), x2: (B, Cout, (H//2)*(W//2)))."""
    B, Cin, HW = x_flat.shape
    Cout = tab["w1"].shape[0]
    Chalf = Cout // 2
    HW2 = (H // 2) * (W // 2)
    full = lambda b: (0, 0)
    return pl.pallas_call(
        functools.partial(_encoder_layer_kernel, W=W),
        out_shape=(jax.ShapeDtypeStruct((B, Chalf, HW), jnp.float32),
                   jax.ShapeDtypeStruct((B, Cout, HW2), jnp.float32)),
        grid=(B,),
        in_specs=[
            pl.BlockSpec((1, Cin, HW), lambda b: (b, 0, 0)),
            pl.BlockSpec(tab["w1"].shape, full),
            pl.BlockSpec(tab["g1"].shape, full),
            pl.BlockSpec(tab["b1"].shape, full),
            pl.BlockSpec(tab["w2"].shape, full),
            pl.BlockSpec(tab["g2"].shape, full),
            pl.BlockSpec(tab["b2"].shape, full),
            pl.BlockSpec(tab["mask"].shape, full),
            pl.BlockSpec(tab["pool"].shape, full),
        ],
        out_specs=(pl.BlockSpec((1, Chalf, HW), lambda b: (b, 0, 0)),
                   pl.BlockSpec((1, Cout, HW2), lambda b: (b, 0, 0))),
        compiler_params=pltpu.CompilerParams(dimension_semantics=("parallel",)),
    )(x_flat, tab["w1"], tab["g1"], tab["b1"], tab["w2"], tab["g2"], tab["b2"],
      tab["mask"], tab["pool"])


# ----------------------------------------------------------------------------
# Parameters + host-side packing (weights, border masks, pooling matrix)
# ----------------------------------------------------------------------------
def init_encoder_params(key, in_c, mid_c, layers):
    params = []
    for _ in range(layers):
        key, k1, k2, k3, k4, k5, k6 = jax.random.split(key, 7)
        ch_in, ch_out = in_c, mid_c
        params.append(dict(
            w1=0.1 * jax.random.normal(k1, (3, 3, ch_in, ch_out), jnp.float32),  # HWIO
            g1=1.0 + 0.1 * jax.random.normal(k2, (ch_out,), jnp.float32),
            b1=0.1 * jax.random.normal(k3, (ch_out,), jnp.float32),
            w2=0.1 * jax.random.normal(k4, (3, 3, ch_out, ch_out), jnp.float32),
            g2=1.0 + 0.1 * jax.random.normal(k5, (ch_out,), jnp.float32),
            b2=0.1 * jax.random.normal(k6, (ch_out,), jnp.float32),
        ))
        in_c, mid_c = mid_c, mid_c * 2
    return params


def _pack_conv_weight(w_hwio):
    """(3, 3, Cin, Cout) HWIO -> (Cout, 9*Cin) packed for the im2col matmul."""
    w = np.asarray(w_hwio, np.float32)
    cout = w.shape[-1]
    return jnp.asarray(np.transpose(w, (3, 0, 1, 2)).reshape(cout, -1),
                       dtype=MATMUL_DTYPE)


def build_layer_tables(params, H, W):
    """Host-side, once: packed weights, border masks and pooling matrices."""
    tables = []
    for p in params:
        cout = p["w1"].shape[-1]
        HW, H2, W2 = H * W, H // 2, W // 2
        w_idx = np.arange(HW) % W
        mask = np.stack([(w_idx != 0), (w_idx != W - 1)]).astype(np.float32)  # (2, HW)
        pool = np.zeros((HW, H2 * W2), np.float32)
        hh, ww = np.divmod(np.arange(HW), W)
        pool[np.arange(HW), (hh // 2) * W2 + (ww // 2)] = 0.25
        tables.append(dict(
            w1=_pack_conv_weight(p["w1"]),
            g1=jnp.asarray(p["g1"], jnp.float32).reshape(cout, 1),
            b1=jnp.asarray(p["b1"], jnp.float32).reshape(cout, 1),
            w2=_pack_conv_weight(p["w2"]),
            g2=jnp.asarray(p["g2"], jnp.float32).reshape(cout, 1),
            b2=jnp.asarray(p["b2"], jnp.float32).reshape(cout, 1),
            mask=jnp.asarray(mask),
            pool=jnp.asarray(pool),
        ))
        H, W = H2, W2
    return tables


def encoder_forward(x_nchw, tables):
    """x_nchw: (B, C, H, W) f32 (same layout as the PyTorch reference).
    Returns list of [x1[:, :c//2], x2] per layer (NCHW)."""
    B, C, H, W = x_nchw.shape
    x_flat = x_nchw.reshape(B, C, H * W)
    res = []
    for tab in tables:
        cout = tab["w1"].shape[0]
        o1, o2 = encoder_layer(x_flat, tab, H, W)
        H2, W2 = H // 2, W // 2
        res.append([o1.reshape(B, cout // 2, H, W), o2.reshape(B, cout, H2, W2)])
        x_flat, H, W = o2, H2, W2
    return res


# ----------------------------------------------------------------------------
# Pure-JAX reference (f32) for correctness checking
# ----------------------------------------------------------------------------
def _ref_conv_in_lrelu(x, w_hwio, g, b):
    y = jax.lax.conv_general_dilated(
        x, w_hwio, window_strides=(1, 1), padding=((1, 1), (1, 1)),
        dimension_numbers=("NCHW", "HWIO", "NCHW"),
        precision=jax.lax.Precision.HIGHEST)
    mean = jnp.mean(y, axis=(2, 3), keepdims=True)
    var = jnp.mean((y - mean) ** 2, axis=(2, 3), keepdims=True)
    y = (y - mean) * jax.lax.rsqrt(var + EPS)
    y = y * g.reshape(1, -1, 1, 1) + b.reshape(1, -1, 1, 1)
    return jnp.where(y >= 0.0, y, NEG_SLOPE * y)


def ref_encoder_forward(x, params):
    res = []
    for p in params:
        y = _ref_conv_in_lrelu(x, p["w1"], p["g1"], p["b1"])
        x1 = _ref_conv_in_lrelu(y, p["w2"], p["g2"], p["b2"])
        B, C, H, W = x1.shape
        x2 = x1.reshape(B, C, H // 2, 2, W // 2, 2).mean(axis=(3, 5))
        res.append([x1[:, : C // 2], x2])
        x = x2
    return res


if __name__ == "__main__":
    # Encoder(in_c=4, mid_c=8, layers=2, affine=True); NCHW input [2, 4, 16, 16].
    key = jax.random.PRNGKey(0)
    kx, kp = jax.random.split(key)
    B, C, H, W = 2, 4, 16, 16
    mid_c, layers = 8, 2

    x = jax.random.normal(kx, (B, C, H, W), jnp.float32)
    params = init_encoder_params(kp, C, mid_c, layers)
    tables = build_layer_tables(params, H, W)

    res = jax.jit(encoder_forward)(x, tables)
    res = jax.block_until_ready(res)

    # Expected shapes (NCHW, matching the PyTorch reference):
    assert res[0][0].shape == (2, 4, 16, 16)
    assert res[0][1].shape == (2, 8, 8, 8)
    assert res[1][0].shape == (2, 8, 8, 8)
    assert res[1][1].shape == (2, 16, 4, 4)

    # Numerical check against the pure-JAX f32 reference.
    ref = ref_encoder_forward(x, params)
    tol = 1e-3 if MATMUL_DTYPE == jnp.float32 else 1e-1  # bf16 MXU operands
    for (a1, a2), (r1, r2) in zip(res, ref):
        np.testing.assert_allclose(np.asarray(a1), np.asarray(r1), rtol=tol, atol=tol)
        np.testing.assert_allclose(np.asarray(a2), np.asarray(r2), rtol=tol, atol=tol)

    print("KERNEL_OK")
</pallas_src>

<mosaic_0001>
module attributes {stable_mosaic.version = 11 : i64} {
  func.func @_encoder_layer_kernel(%arg0: i32, %arg1: memref<1x4x256xf32, #tpu.memory_space<vmem>>, %arg2: memref<8x36xbf16, #tpu.memory_space<vmem>>, %arg3: memref<8x1xf32, #tpu.memory_space<vmem>>, %arg4: memref<8x1xf32, #tpu.memory_space<vmem>>, %arg5: memref<8x72xbf16, #tpu.memory_space<vmem>>, %arg6: memref<8x1xf32, #tpu.memory_space<vmem>>, %arg7: memref<8x1xf32, #tpu.memory_space<vmem>>, %arg8: memref<2x256xf32, #tpu.memory_space<vmem>>, %arg9: memref<256x64xf32, #tpu.memory_space<vmem>>, %arg10: memref<1x4x256xf32, #tpu.memory_space<vmem>>, %arg11: memref<1x8x64xf32, #tpu.memory_space<vmem>>) attributes {dimension_semantics = [#tpu.dimension_semantics<parallel>], iteration_bounds = array<i64: 2>, scalar_prefetch = 0 : i64, scratch_operands = 0 : i64, tpu.core_type = #tpu.core_type<tc>, window_params = [{transform_indices = @transform_0, window_bounds = array<i64: 1, 4, 256>}, {pipeline_mode = #tpu.pipeline_mode<synchronous>, transform_indices = @transform_1, window_bounds = array<i64: 8, 36>}, {pipeline_mode = #tpu.pipeline_mode<synchronous>, transform_indices = @transform_2, window_bounds = array<i64: 8, 1>}, {pipeline_mode = #tpu.pipeline_mode<synchronous>, transform_indices = @transform_3, window_bounds = array<i64: 8, 1>}, {pipeline_mode = #tpu.pipeline_mode<synchronous>, transform_indices = @transform_4, window_bounds = array<i64: 8, 72>}, {pipeline_mode = #tpu.pipeline_mode<synchronous>, transform_indices = @transform_5, window_bounds = array<i64: 8, 1>}, {pipeline_mode = #tpu.pipeline_mode<synchronous>, transform_indices = @transform_6, window_bounds = array<i64: 8, 1>}, {pipeline_mode = #tpu.pipeline_mode<synchronous>, transform_indices = @transform_7, window_bounds = array<i64: 2, 256>}, {pipeline_mode = #tpu.pipeline_mode<synchronous>, transform_indices = @transform_8, window_bounds = array<i64: 256, 64>}, {transform_indices = @transform_9, window_bounds = array<i64: 1, 4, 256>}, {transform_indices = @transform_10, window_bounds = array<i64: 1, 8, 64>}]} {
    %c0 = arith.constant 0 : index
    %c0_0 = arith.constant 0 : index
    %c0_1 = arith.constant 0 : index
    %0 = vector.load %arg1[%c0, %c0_0, %c0_1] : memref<1x4x256xf32, #tpu.memory_space<vmem>>, vector<1x4x256xf32>
    %1 = vector.shape_cast %0 : vector<1x4x256xf32> to vector<4x256xf32>
    %c0_2 = arith.constant 0 : index
    %c0_3 = arith.constant 0 : index
    %2 = vector.load %arg8[%c0_2, %c0_3] : memref<2x256xf32, #tpu.memory_space<vmem>>, vector<1x256xf32>
    %c1 = arith.constant 1 : index
    %c0_4 = arith.constant 0 : index
    %3 = vector.load %arg8[%c1, %c0_4] : memref<2x256xf32, #tpu.memory_space<vmem>>, vector<1x256xf32>
    %c0_5 = arith.constant 0 : index
    %c0_6 = arith.constant 0 : index
    %4 = vector.load %arg2[%c0_5, %c0_6] : memref<8x36xbf16, #tpu.memory_space<vmem>>, vector<8x36xbf16>
    %c0_7 = arith.constant 0 : index
    %c0_8 = arith.constant 0 : index
    %5 = vector.load %arg3[%c0_7, %c0_8] : memref<8x1xf32, #tpu.memory_space<vmem>>, vector<8x1xf32>
    %c0_9 = arith.constant 0 : index
    %c0_10 = arith.constant 0 : index
    %6 = vector.load %arg4[%c0_9, %c0_10] : memref<8x1xf32, #tpu.memory_space<vmem>>, vector<8x1xf32>
    %cst = arith.constant 0.000000e+00 : f32
    %7 = vector.broadcast %cst : f32 to vector<4x1xf32>
    %8 = vector.extract_strided_slice %1 {offsets = [0, 0], sizes = [4, 255], strides = [1, 1]} : vector<4x256xf32> to vector<4x255xf32>
    %9 = tpu.concatenate %7, %8 in 1 : vector<4x1xf32>, vector<4x255xf32> -> vector<4x256xf32>
    %10 = vector.broadcast %2 : vector<1x256xf32> to vector<4x256xf32>
    %11 = arith.mulf %9, %10 : vector<4x256xf32>
    %12 = vector.extract_strided_slice %1 {offsets = [0, 1], sizes = [4, 255], strides = [1, 1]} : vector<4x256xf32> to vector<4x255xf32>
    %13 = tpu.concatenate %12, %7 in 1 : vector<4x255xf32>, vector<4x1xf32> -> vector<4x256xf32>
    %14 = vector.broadcast %3 : vector<1x256xf32> to vector<4x256xf32>
    %15 = arith.mulf %13, %14 : vector<4x256xf32>
    %16 = tpu.concatenate %11, %1, %15 in 0 : vector<4x256xf32>, vector<4x256xf32>, vector<4x256xf32> -> vector<12x256xf32>
    %cst_11 = arith.constant 0.000000e+00 : f32
    %17 = vector.broadcast %cst_11 : f32 to vector<12x16xf32>
    %18 = vector.extract_strided_slice %16 {offsets = [0, 0], sizes = [12, 240], strides = [1, 1]} : vector<12x256xf32> to vector<12x240xf32>
    %19 = tpu.concatenate %17, %18 in 1 : vector<12x16xf32>, vector<12x240xf32> -> vector<12x256xf32>
    %20 = vector.extract_strided_slice %16 {offsets = [0, 16], sizes = [12, 240], strides = [1, 1]} : vector<12x256xf32> to vector<12x240xf32>
    %21 = tpu.concatenate %20, %17 in 1 : vector<12x240xf32>, vector<12x16xf32> -> vector<12x256xf32>
    %22 = tpu.concatenate %19, %16, %21 in 0 : vector<12x256xf32>, vector<12x256xf32>, vector<12x256xf32> -> vector<36x256xf32>
    %23 = arith.truncf %22 : vector<36x256xf32> to vector<36x256xbf16>
    %cst_12 = arith.constant dense<0.000000e+00> : vector<8x256xf32>
    %24 = tpu.matmul %4, %23, %cst_12 {dimension_numbers = #tpu.dot_dimension_numbers<[1], [0], [0], [1], [0, 0, 1, 1], [], []>} : vector<8x36xbf16>, vector<36x256xbf16>, vector<8x256xf32> -> vector<8x256xf32>
    %cst_13 = arith.constant dense<0.000000e+00> : vector<8xf32>
    %25 = vector.multi_reduction <add>, %24, %cst_13 [1] : vector<8x256xf32> to vector<8xf32>
    %26 = vector.shape_cast %25 : vector<8xf32> to vector<8x1xf32>
    %cst_14 = arith.constant 2.560000e+02 : f32
    %27 = vector.broadcast %cst_14 : f32 to vector<8x1xf32>
    %28 = arith.divf %26, %27 : vector<8x1xf32>
    %29 = vector.broadcast %28 : vector<8x1xf32> to vector<8x256xf32>
    %30 = arith.subf %24, %29 : vector<8x256xf32>
    %31 = arith.mulf %30, %30 : vector<8x256xf32>
    %cst_15 = arith.constant dense<0.000000e+00> : vector<8xf32>
    %32 = vector.multi_reduction <add>, %31, %cst_15 [1] : vector<8x256xf32> to vector<8xf32>
    %33 = vector.shape_cast %32 : vector<8xf32> to vector<8x1xf32>
    %cst_16 = arith.constant 2.560000e+02 : f32
    %34 = vector.broadcast %cst_16 : f32 to vector<8x1xf32>
    %35 = arith.divf %33, %34 : vector<8x1xf32>
    %cst_17 = arith.constant 9.99999974E-6 : f32
    %36 = vector.broadcast %cst_17 : f32 to vector<8x1xf32>
    %37 = arith.addf %35, %36 : vector<8x1xf32>
    %38 = math.rsqrt %37 : vector<8x1xf32>
    %39 = vector.broadcast %38 : vector<8x1xf32> to vector<8x256xf32>
    %40 = arith.mulf %30, %39 : vector<8x256xf32>
    %41 = vector.broadcast %5 : vector<8x1xf32> to vector<8x256xf32>
    %42 = arith.mulf %40, %41 : vector<8x256xf32>
    %43 = vector.broadcast %6 : vector<8x1xf32> to vector<8x256xf32>
    %44 = arith.addf %42, %43 : vector<8x256xf32>
    %cst_18 = arith.constant 0.000000e+00 : f32
    %45 = vector.broadcast %cst_18 : f32 to vector<8x256xf32>
    %46 = arith.cmpf oge, %44, %45 : vector<8x256xf32>
    %cst_19 = arith.constant 0.00999999977 : f32
    %47 = vector.broadcast %cst_19 : f32 to vector<8x256xf32>
    %48 = arith.mulf %47, %44 : vector<8x256xf32>
    %49 = arith.select %46, %44, %48 : vector<8x256xi1>, vector<8x256xf32>
    %c0_20 = arith.constant 0 : index
    %c0_21 = arith.constant 0 : index
    %50 = vector.load %arg5[%c0_20, %c0_21] : memref<8x72xbf16, #tpu.memory_space<vmem>>, vector<8x72xbf16>
    %c0_22 = arith.constant 0 : index
    %c0_23 = arith.constant 0 : index
    %51 = vector.load %arg6[%c0_22, %c0_23] : memref<8x1xf32, #tpu.memory_space<vmem>>, vector<8x1xf32>
    %c0_24 = arith.constant 0 : index
    %c0_25 = arith.constant 0 : index
    %52 = vector.load %arg7[%c0_24, %c0_25] : memref<8x1xf32, #tpu.memory_space<vmem>>, vector<8x1xf32>
    %cst_26 = arith.constant 0.000000e+00 : f32
    %53 = vector.broadcast %cst_26 : f32 to vector<8x1xf32>
    %54 = vector.extract_strided_slice %49 {offsets = [0, 0], sizes = [8, 255], strides = [1, 1]} : vector<8x256xf32> to vector<8x255xf32>
    %55 = tpu.concatenate %53, %54 in 1 : vector<8x1xf32>, vector<8x255xf32> -> vector<8x256xf32>
    %56 = vector.broadcast %2 : vector<1x256xf32> to vector<8x256xf32>
    %57 = arith.mulf %55, %56 : vector<8x256xf32>
    %58 = vector.extract_strided_slice %49 {offsets = [0, 1], sizes = [8, 255], strides = [1, 1]} : vector<8x256xf32> to vector<8x255xf32>
    %59 = tpu.concatenate %58, %53 in 1 : vector<8x255xf32>, vector<8x1xf32> -> vector<8x256xf32>
    %60 = vector.broadcast %3 : vector<1x256xf32> to vector<8x256xf32>
    %61 = arith.mulf %59, %60 : vector<8x256xf32>
    %62 = tpu.concatenate %57, %49, %61 in 0 : vector<8x256xf32>, vector<8x256xf32>, vector<8x256xf32> -> vector<24x256xf32>
    %cst_27 = arith.constant 0.000000e+00 : f32
    %63 = vector.broadcast %cst_27 : f32 to vector<24x16xf32>
    %64 = vector.extract_strided_slice %62 {offsets = [0, 0], sizes = [24, 240], strides = [1, 1]} : vector<24x256xf32> to vector<24x240xf32>
    %65 = tpu.concatenate %63, %64 in 1 : vector<24x16xf32>, vector<24x240xf32> -> vector<24x256xf32>
    %66 = vector.extract_strided_slice %62 {offsets = [0, 16], sizes = [24, 240], strides = [1, 1]} : vector<24x256xf32> to vector<24x240xf32>
    %67 = tpu.concatenate %66, %63 in 1 : vector<24x240xf32>, vector<24x16xf32> -> vector<24x256xf32>
    %68 = tpu.concatenate %65, %62, %67 in 0 : vector<24x256xf32>, vector<24x256xf32>, vector<24x256xf32> -> vector<72x256xf32>
    %69 = arith.truncf %68 : vector<72x256xf32> to vector<72x256xbf16>
    %cst_28 = arith.constant dense<0.000000e+00> : vector<8x256xf32>
    %70 = tpu.matmul %50, %69, %cst_28 {dimension_numbers = #tpu.dot_dimension_numbers<[1], [0], [0], [1], [0, 0, 1, 1], [], []>} : vector<8x72xbf16>, vector<72x256xbf16>, vector<8x256xf32> -> vector<8x256xf32>
    %cst_29 = arith.constant dense<0.000000e+00> : vector<8xf32>
    %71 = vector.multi_reduction <add>, %70, %cst_29 [1] : vector<8x256xf32> to vector<8xf32>
    %72 = vector.shape_cast %71 : vector<8xf32> to vector<8x1xf32>
    %cst_30 = arith.constant 2.560000e+02 : f32
    %73 = vector.broadcast %cst_30 : f32 to vector<8x1xf32>
    %74 = arith.divf %72, %73 : vector<8x1xf32>
    %75 = vector.broadcast %74 : vector<8x1xf32> to vector<8x256xf32>
    %76 = arith.subf %70, %75 : vector<8x256xf32>
    %77 = arith.mulf %76, %76 : vector<8x256xf32>
    %cst_31 = arith.constant dense<0.000000e+00> : vector<8xf32>
    %78 = vector.multi_reduction <add>, %77, %cst_31 [1] : vector<8x256xf32> to vector<8xf32>
    %79 = vector.shape_cast %78 : vector<8xf32> to vector<8x1xf32>
    %cst_32 = arith.constant 2.560000e+02 : f32
    %80 = vector.broadcast %cst_32 : f32 to vector<8x1xf32>
    %81 = arith.divf %79, %80 : vector<8x1xf32>
    %cst_33 = arith.constant 9.99999974E-6 : f32
    %82 = vector.broadcast %cst_33 : f32 to vector<8x1xf32>
    %83 = arith.addf %81, %82 : vector<8x1xf32>
    %84 = math.rsqrt %83 : vector<8x1xf32>
    %85 = vector.broadcast %84 : vector<8x1xf32> to vector<8x256xf32>
    %86 = arith.mulf %76, %85 : vector<8x256xf32>
    %87 = vector.broadcast %51 : vector<8x1xf32> to vector<8x256xf32>
    %88 = arith.mulf %86, %87 : vector<8x256xf32>
    %89 = vector.broadcast %52 : vector<8x1xf32> to vector<8x256xf32>
    %90 = arith.addf %88, %89 : vector<8x256xf32>
    %cst_34 = arith.constant 0.000000e+00 : f32
    %91 = vector.broadcast %cst_34 : f32 to vector<8x256xf32>
    %92 = arith.cmpf oge, %90, %91 : vector<8x256xf32>
    %cst_35 = arith.constant 0.00999999977 : f32
    %93 = vector.broadcast %cst_35 : f32 to vector<8x256xf32>
    %94 = arith.mulf %93, %90 : vector<8x256xf32>
    %95 = arith.select %92, %90, %94 : vector<8x256xi1>, vector<8x256xf32>
    %96 = vector.extract_strided_slice %95 {offsets = [0, 0], sizes = [4, 256], strides = [1, 1]} : vector<8x256xf32> to vector<4x256xf32>
    %97 = vector.shape_cast %96 : vector<4x256xf32> to vector<1x4x256xf32>
    %c0_36 = arith.constant 0 : index
    %c0_37 = arith.constant 0 : index
    %c0_38 = arith.constant 0 : index
    %98 = vector.load %arg10[%c0_36, %c0_37, %c0_38] : memref<1x4x256xf32, #tpu.memory_space<vmem>>, vector<1x4x256xf32>
    tpu.vector_store %arg10[%c0_36, %c0_37, %c0_38], %97 {strides = array<i32>} : memref<1x4x256xf32, #tpu.memory_space<vmem>>, vector<1x4x256xf32>,
    %c0_39 = arith.constant 0 : index
    %c0_40 = arith.constant 0 : index
    %99 = vector.load %arg9[%c0_39, %c0_40] : memref<256x64xf32, #tpu.memory_space<vmem>>, vector<256x64xf32>
    %cst_41 = arith.constant dense<0.000000e+00> : vector<8x64xf32>
    %100 = tpu.matmul %95, %99, %cst_41 {dimension_numbers = #tpu.dot_dimension_numbers<[1], [0], [0], [1], [0, 0, 1, 1], [], []>} : vector<8x256xf32>, vector<256x64xf32>, vector<8x64xf32> -> vector<8x64xf32>
    %101 = vector.shape_cast %100 : vector<8x64xf32> to vector<1x8x64xf32>
    %c0_42 = arith.constant 0 : index
    %c0_43 = arith.constant 0 : index
    %c0_44 = arith.constant 0 : index
    %102 = vector.load %arg11[%c0_42, %c0_43, %c0_44] : memref<1x8x64xf32, #tpu.memory_space<vmem>>, vector<1x8x64xf32>
    tpu.vector_store %arg11[%c0_42, %c0_43, %c0_44], %101 {strides = array<i32>} : memref<1x8x64xf32, #tpu.memory_space<vmem>>, vector<1x8x64xf32>,
    return
  }
  func.func @transform_0(%arg0: i32) -> (i32, i32, i32) {
    %c0_i32 = arith.constant 0 : i32
    %c0_i32_0 = arith.constant 0 : i32
    %c0_i32_1 = arith.constant 0 : i32
    return %arg0, %c0_i32, %c0_i32_0 : i32, i32, i32
  }
  func.func @transform_1(%arg0: i32) -> (i32, i32) {
    %c0_i32 = arith.constant 0 : i32
    %c0_i32_0 = arith.constant 0 : i32
    %c0_i32_1 = arith.constant 0 : i32
    return %c0_i32, %c0_i32_0 : i32, i32
  }
  func.func @transform_2(%arg0: i32) -> (i32, i32) {
    %c0_i32 = arith.constant 0 : i32
    %c0_i32_0 = arith.constant 0 : i32
    %c0_i32_1 = arith.constant 0 : i32
    return %c0_i32, %c0_i32_0 : i32, i32
  }
  func.func @transform_3(%arg0: i32) -> (i32, i32) {
    %c0_i32 = arith.constant 0 : i32
    %c0_i32_0 = arith.constant 0 : i32
    %c0_i32_1 = arith.constant 0 : i32
    return %c0_i32, %c0_i32_0 : i32, i32
  }
  func.func @transform_4(%arg0: i32) -> (i32, i32) {
    %c0_i32 = arith.constant 0 : i32
    %c0_i32_0 = arith.constant 0 : i32
    %c0_i32_1 = arith.constant 0 : i32
    return %c0_i32, %c0_i32_0 : i32, i32
  }
  func.func @transform_5(%arg0: i32) -> (i32, i32) {
    %c0_i32 = arith.constant 0 : i32
    %c0_i32_0 = arith.constant 0 : i32
    %c0_i32_1 = arith.constant 0 : i32
    return %c0_i32, %c0_i32_0 : i32, i32
  }
  func.func @transform_6(%arg0: i32) -> (i32, i32) {
    %c0_i32 = arith.constant 0 : i32
    %c0_i32_0 = arith.constant 0 : i32
    %c0_i32_1 = arith.constant 0 : i32
    return %c0_i32, %c0_i32_0 : i32, i32
  }
  func.func @transform_7(%arg0: i32) -> (i32, i32) {
    %c0_i32 = arith.constant 0 : i32
    %c0_i32_0 = arith.constant 0 : i32
    %c0_i32_1 = arith.constant 0 : i32
    return %c0_i32, %c0_i32_0 : i32, i32
  }
  func.func @transform_8(%arg0: i32) -> (i32, i32) {
    %c0_i32 = arith.constant 0 : i32
    %c0_i32_0 = arith.constant 0 : i32
    %c0_i32_1 = arith.constant 0 : i32
    return %c0_i32, %c0_i32_0 : i32, i32
  }
  func.func @transform_9(%arg0: i32) -> (i32, i32, i32) {
    %c0_i32 = arith.constant 0 : i32
    %c0_i32_0 = arith.constant 0 : i32
    %c0_i32_1 = arith.constant 0 : i32
    return %arg0, %c0_i32, %c0_i32_0 : i32, i32, i32
  }
  func.func @transform_10(%arg0: i32) -> (i32, i32, i32) {
    %c0_i32 = arith.constant 0 : i32
    %c0_i32_0 = arith.constant 0 : i32
    %c0_i32_1 = arith.constant 0 : i32
    return %arg0, %c0_i32, %c0_i32_0 : i32, i32, i32
  }
}

module attributes {stable_mosaic.version = 11 : i64} {
  func.func @_encoder_layer_kernel(%arg0: i32, %arg1: memref<1x8x64xf32, #tpu.memory_space<vmem>>, %arg2: memref<16x72xbf16, #tpu.memory_space<vmem>>, %arg3: memref<16x1xf32, #tpu.memory_space<vmem>>, %arg4: memref<16x1xf32, #tpu.memory_space<vmem>>, %arg5: memref<16x144xbf16, #tpu.memory_space<vmem>>, %arg6: memref<16x1xf32, #tpu.memory_space<vmem>>, %arg7: memref<16x1xf32, #tpu.memory_space<vmem>>, %arg8: memref<2x64xf32, #tpu.memory_space<vmem>>, %arg9: memref<64x16xf32, #tpu.memory_space<vmem>>, %arg10: memref<1x8x64xf32, #tpu.memory_space<vmem>>, %arg11: memref<1x16x16xf32, #tpu.memory_space<vmem>>) attributes {dimension_semantics = [#tpu.dimension_semantics<parallel>], iteration_bounds = array<i64: 2>, scalar_prefetch = 0 : i64, scratch_operands = 0 : i64, tpu.core_type = #tpu.core_type<tc>, window_params = [{transform_indices = @transform_0, window_bounds = array<i64: 1, 8, 64>}, {pipeline_mode = #tpu.pipeline_mode<synchronous>, transform_indices = @transform_1, window_bounds = array<i64: 16, 72>}, {pipeline_mode = #tpu.pipeline_mode<synchronous>, transform_indices = @transform_2, window_bounds = array<i64: 16, 1>}, {pipeline_mode = #tpu.pipeline_mode<synchronous>, transform_indices = @transform_3, window_bounds = array<i64: 16, 1>}, {pipeline_mode = #tpu.pipeline_mode<synchronous>, transform_indices = @transform_4, window_bounds = array<i64: 16, 144>}, {pipeline_mode = #tpu.pipeline_mode<synchronous>, transform_indices = @transform_5, window_bounds = array<i64: 16, 1>}, {pipeline_mode = #tpu.pipeline_mode<synchronous>, transform_indices = @transform_6, window_bounds = array<i64: 16, 1>}, {pipeline_mode = #tpu.pipeline_mode<synchronous>, transform_indices = @transform_7, window_bounds = array<i64: 2, 64>}, {pipeline_mode = #tpu.pipeline_mode<synchronous>, transform_indices = @transform_8, window_bounds = array<i64: 64, 16>}, {transform_indices = @transform_9, window_bounds = array<i64: 1, 8, 64>}, {transform_indices = @transform_10, window_bounds = array<i64: 1, 16, 16>}]} {
    %c0 = arith.constant 0 : index
    %c0_0 = arith.constant 0 : index
    %c0_1 = arith.constant 0 : index
    %0 = vector.load %arg1[%c0, %c0_0, %c0_1] : memref<1x8x64xf32, #tpu.memory_space<vmem>>, vector<1x8x64xf32>
    %1 = vector.shape_cast %0 : vector<1x8x64xf32> to vector<8x64xf32>
    %c0_2 = arith.constant 0 : index
    %c0_3 = arith.constant 0 : index
    %2 = vector.load %arg8[%c0_2, %c0_3] : memref<2x64xf32, #tpu.memory_space<vmem>>, vector<1x64xf32>
    %c1 = arith.constant 1 : index
    %c0_4 = arith.constant 0 : index
    %3 = vector.load %arg8[%c1, %c0_4] : memref<2x64xf32, #tpu.memory_space<vmem>>, vector<1x64xf32>
    %c0_5 = arith.constant 0 : index
    %c0_6 = arith.constant 0 : index
    %4 = vector.load %arg2[%c0_5, %c0_6] : memref<16x72xbf16, #tpu.memory_space<vmem>>, vector<16x72xbf16>
    %c0_7 = arith.constant 0 : index
    %c0_8 = arith.constant 0 : index
    %5 = vector.load %arg3[%c0_7, %c0_8] : memref<16x1xf32, #tpu.memory_space<vmem>>, vector<16x1xf32>
    %c0_9 = arith.constant 0 : index
    %c0_10 = arith.constant 0 : index
    %6 = vector.load %arg4[%c0_9, %c0_10] : memref<16x1xf32, #tpu.memory_space<vmem>>, vector<16x1xf32>
    %cst = arith.constant 0.000000e+00 : f32
    %7 = vector.broadcast %cst : f32 to vector<8x1xf32>
    %8 = vector.extract_strided_slice %1 {offsets = [0, 0], sizes = [8, 63], strides = [1, 1]} : vector<8x64xf32> to vector<8x63xf32>
    %9 = tpu.concatenate %7, %8 in 1 : vector<8x1xf32>, vector<8x63xf32> -> vector<8x64xf32>
    %10 = vector.broadcast %2 : vector<1x64xf32> to vector<8x64xf32>
    %11 = arith.mulf %9, %10 : vector<8x64xf32>
    %12 = vector.extract_strided_slice %1 {offsets = [0, 1], sizes = [8, 63], strides = [1, 1]} : vector<8x64xf32> to vector<8x63xf32>
    %13 = tpu.concatenate %12, %7 in 1 : vector<8x63xf32>, vector<8x1xf32> -> vector<8x64xf32>
    %14 = vector.broadcast %3 : vector<1x64xf32> to vector<8x64xf32>
    %15 = arith.mulf %13, %14 : vector<8x64xf32>
    %16 = tpu.concatenate %11, %1, %15 in 0 : vector<8x64xf32>, vector<8x64xf32>, vector<8x64xf32> -> vector<24x64xf32>
    %cst_11 = arith.constant 0.000000e+00 : f32
    %17 = vector.broadcast %cst_11 : f32 to vector<24x8xf32>
    %18 = vector.extract_strided_slice %16 {offsets = [0, 0], sizes = [24, 56], strides = [1, 1]} : vector<24x64xf32> to vector<24x56xf32>
    %19 = tpu.concatenate %17, %18 in 1 : vector<24x8xf32>, vector<24x56xf32> -> vector<24x64xf32>
    %20 = vector.extract_strided_slice %16 {offsets = [0, 8], sizes = [24, 56], strides = [1, 1]} : vector<24x64xf32> to vector<24x56xf32>
    %21 = tpu.concatenate %20, %17 in 1 : vector<24x56xf32>, vector<24x8xf32> -> vector<24x64xf32>
    %22 = tpu.concatenate %19, %16, %21 in 0 : vector<24x64xf32>, vector<24x64xf32>, vector<24x64xf32> -> vector<72x64xf32>
    %23 = arith.truncf %22 : vector<72x64xf32> to vector<72x64xbf16>
    %cst_12 = arith.constant dense<0.000000e+00> : vector<16x64xf32>
    %24 = tpu.matmul %4, %23, %cst_12 {dimension_numbers = #tpu.dot_dimension_numbers<[1], [0], [0], [1], [0, 0, 1, 1], [], []>} : vector<16x72xbf16>, vector<72x64xbf16>, vector<16x64xf32> -> vector<16x64xf32>
    %cst_13 = arith.constant dense<0.000000e+00> : vector<16xf32>
    %25 = vector.multi_reduction <add>, %24, %cst_13 [1] : vector<16x64xf32> to vector<16xf32>
    %26 = vector.shape_cast %25 : vector<16xf32> to vector<16x1xf32>
    %cst_14 = arith.constant 6.400000e+01 : f32
    %27 = vector.broadcast %cst_14 : f32 to vector<16x1xf32>
    %28 = arith.divf %26, %27 : vector<16x1xf32>
    %29 = vector.broadcast %28 : vector<16x1xf32> to vector<16x64xf32>
    %30 = arith.subf %24, %29 : vector<16x64xf32>
    %31 = arith.mulf %30, %30 : vector<16x64xf32>
    %cst_15 = arith.constant dense<0.000000e+00> : vector<16xf32>
    %32 = vector.multi_reduction <add>, %31, %cst_15 [1] : vector<16x64xf32> to vector<16xf32>
    %33 = vector.shape_cast %32 : vector<16xf32> to vector<16x1xf32>
    %cst_16 = arith.constant 6.400000e+01 : f32
    %34 = vector.broadcast %cst_16 : f32 to vector<16x1xf32>
    %35 = arith.divf %33, %34 : vector<16x1xf32>
    %cst_17 = arith.constant 9.99999974E-6 : f32
    %36 = vector.broadcast %cst_17 : f32 to vector<16x1xf32>
    %37 = arith.addf %35, %36 : vector<16x1xf32>
    %38 = math.rsqrt %37 : vector<16x1xf32>
    %39 = vector.broadcast %38 : vector<16x1xf32> to vector<16x64xf32>
    %40 = arith.mulf %30, %39 : vector<16x64xf32>
    %41 = vector.broadcast %5 : vector<16x1xf32> to vector<16x64xf32>
    %42 = arith.mulf %40, %41 : vector<16x64xf32>
    %43 = vector.broadcast %6 : vector<16x1xf32> to vector<16x64xf32>
    %44 = arith.addf %42, %43 : vector<16x64xf32>
    %cst_18 = arith.constant 0.000000e+00 : f32
    %45 = vector.broadcast %cst_18 : f32 to vector<16x64xf32>
    %46 = arith.cmpf oge, %44, %45 : vector<16x64xf32>
    %cst_19 = arith.constant 0.00999999977 : f32
    %47 = vector.broadcast %cst_19 : f32 to vector<16x64xf32>
    %48 = arith.mulf %47, %44 : vector<16x64xf32>
    %49 = arith.select %46, %44, %48 : vector<16x64xi1>, vector<16x64xf32>
    %c0_20 = arith.constant 0 : index
    %c0_21 = arith.constant 0 : index
    %50 = vector.load %arg5[%c0_20, %c0_21] : memref<16x144xbf16, #tpu.memory_space<vmem>>, vector<16x144xbf16>
    %c0_22 = arith.constant 0 : index
    %c0_23 = arith.constant 0 : index
    %51 = vector.load %arg6[%c0_22, %c0_23] : memref<16x1xf32, #tpu.memory_space<vmem>>, vector<16x1xf32>
    %c0_24 = arith.constant 0 : index
    %c0_25 = arith.constant 0 : index
    %52 = vector.load %arg7[%c0_24, %c0_25] : memref<16x1xf32, #tpu.memory_space<vmem>>, vector<16x1xf32>
    %cst_26 = arith.constant 0.000000e+00 : f32
    %53 = vector.broadcast %cst_26 : f32 to vector<16x1xf32>
    %54 = vector.extract_strided_slice %49 {offsets = [0, 0], sizes = [16, 63], strides = [1, 1]} : vector<16x64xf32> to vector<16x63xf32>
    %55 = tpu.concatenate %53, %54 in 1 : vector<16x1xf32>, vector<16x63xf32> -> vector<16x64xf32>
    %56 = vector.broadcast %2 : vector<1x64xf32> to vector<16x64xf32>
    %57 = arith.mulf %55, %56 : vector<16x64xf32>
    %58 = vector.extract_strided_slice %49 {offsets = [0, 1], sizes = [16, 63], strides = [1, 1]} : vector<16x64xf32> to vector<16x63xf32>
    %59 = tpu.concatenate %58, %53 in 1 : vector<16x63xf32>, vector<16x1xf32> -> vector<16x64xf32>
    %60 = vector.broadcast %3 : vector<1x64xf32> to vector<16x64xf32>
    %61 = arith.mulf %59, %60 : vector<16x64xf32>
    %62 = tpu.concatenate %57, %49, %61 in 0 : vector<16x64xf32>, vector<16x64xf32>, vector<16x64xf32> -> vector<48x64xf32>
    %cst_27 = arith.constant 0.000000e+00 : f32
    %63 = vector.broadcast %cst_27 : f32 to vector<48x8xf32>
    %64 = vector.extract_strided_slice %62 {offsets = [0, 0], sizes = [48, 56], strides = [1, 1]} : vector<48x64xf32> to vector<48x56xf32>
    %65 = tpu.concatenate %63, %64 in 1 : vector<48x8xf32>, vector<48x56xf32> -> vector<48x64xf32>
    %66 = vector.extract_strided_slice %62 {offsets = [0, 8], sizes = [48, 56], strides = [1, 1]} : vector<48x64xf32> to vector<48x56xf32>
    %67 = tpu.concatenate %66, %63 in 1 : vector<48x56xf32>, vector<48x8xf32> -> vector<48x64xf32>
    %68 = tpu.concatenate %65, %62, %67 in 0 : vector<48x64xf32>, vector<48x64xf32>, vector<48x64xf32> -> vector<144x64xf32>
    %69 = arith.truncf %68 : vector<144x64xf32> to vector<144x64xbf16>
    %cst_28 = arith.constant dense<0.000000e+00> : vector<16x64xf32>
    %70 = tpu.matmul %50, %69, %cst_28 {dimension_numbers = #tpu.dot_dimension_numbers<[1], [0], [0], [1], [0, 0, 1, 1], [], []>} : vector<16x144xbf16>, vector<144x64xbf16>, vector<16x64xf32> -> vector<16x64xf32>
    %cst_29 = arith.constant dense<0.000000e+00> : vector<16xf32>
    %71 = vector.multi_reduction <add>, %70, %cst_29 [1] : vector<16x64xf32> to vector<16xf32>
    %72 = vector.shape_cast %71 : vector<16xf32> to vector<16x1xf32>
    %cst_30 = arith.constant 6.400000e+01 : f32
    %73 = vector.broadcast %cst_30 : f32 to vector<16x1xf32>
    %74 = arith.divf %72, %73 : vector<16x1xf32>
    %75 = vector.broadcast %74 : vector<16x1xf32> to vector<16x64xf32>
    %76 = arith.subf %70, %75 : vector<16x64xf32>
    %77 = arith.mulf %76, %76 : vector<16x64xf32>
    %cst_31 = arith.constant dense<0.000000e+00> : vector<16xf32>
    %78 = vector.multi_reduction <add>, %77, %cst_31 [1] : vector<16x64xf32> to vector<16xf32>
    %79 = vector.shape_cast %78 : vector<16xf32> to vector<16x1xf32>
    %cst_32 = arith.constant 6.400000e+01 : f32
    %80 = vector.broadcast %cst_32 : f32 to vector<16x1xf32>
    %81 = arith.divf %79, %80 : vector<16x1xf32>
    %cst_33 = arith.constant 9.99999974E-6 : f32
    %82 = vector.broadcast %cst_33 : f32 to vector<16x1xf32>
    %83 = arith.addf %81, %82 : vector<16x1xf32>
    %84 = math.rsqrt %83 : vector<16x1xf32>
    %85 = vector.broadcast %84 : vector<16x1xf32> to vector<16x64xf32>
    %86 = arith.mulf %76, %85 : vector<16x64xf32>
    %87 = vector.broadcast %51 : vector<16x1xf32> to vector<16x64xf32>
    %88 = arith.mulf %86, %87 : vector<16x64xf32>
    %89 = vector.broadcast %52 : vector<16x1xf32> to vector<16x64xf32>
    %90 = arith.addf %88, %89 : vector<16x64xf32>
    %cst_34 = arith.constant 0.000000e+00 : f32
    %91 = vector.broadcast %cst_34 : f32 to vector<16x64xf32>
    %92 = arith.cmpf oge, %90, %91 : vector<16x64xf32>
    %cst_35 = arith.constant 0.00999999977 : f32
    %93 = vector.broadcast %cst_35 : f32 to vector<16x64xf32>
    %94 = arith.mulf %93, %90 : vector<16x64xf32>
    %95 = arith.select %92, %90, %94 : vector<16x64xi1>, vector<16x64xf32>
    %96 = vector.extract_strided_slice %95 {offsets = [0, 0], sizes = [8, 64], strides = [1, 1]} : vector<16x64xf32> to vector<8x64xf32>
    %97 = vector.shape_cast %96 : vector<8x64xf32> to vector<1x8x64xf32>
    %c0_36 = arith.constant 0 : index
    %c0_37 = arith.constant 0 : index
    %c0_38 = arith.constant 0 : index
    %98 = vector.load %arg10[%c0_36, %c0_37, %c0_38] : memref<1x8x64xf32, #tpu.memory_space<vmem>>, vector<1x8x64xf32>
    tpu.vector_store %arg10[%c0_36, %c0_37, %c0_38], %97 {strides = array<i32>} : memref<1x8x64xf32, #tpu.memory_space<vmem>>, vector<1x8x64xf32>,
    %c0_39 = arith.constant 0 : index
    %c0_40 = arith.constant 0 : index
    %99 = vector.load %arg9[%c0_39, %c0_40] : memref<64x16xf32, #tpu.memory_space<vmem>>, vector<64x16xf32>
    %cst_41 = arith.constant dense<0.000000e+00> : vector<16x16xf32>
    %100 = tpu.matmul %95, %99, %cst_41 {dimension_numbers = #tpu.dot_dimension_numbers<[1], [0], [0], [1], [0, 0, 1, 1], [], []>} : vector<16x64xf32>, vector<64x16xf32>, vector<16x16xf32> -> vector<16x16xf32>
    %101 = vector.shape_cast %100 : vector<16x16xf32> to vector<1x16x16xf32>
    %c0_42 = arith.constant 0 : index
    %c0_43 = arith.constant 0 : index
    %c0_44 = arith.constant 0 : index
    %102 = vector.load %arg11[%c0_42, %c0_43, %c0_44] : memref<1x16x16xf32, #tpu.memory_space<vmem>>, vector<1x16x16xf32>
    tpu.vector_store %arg11[%c0_42, %c0_43, %c0_44], %101 {strides = array<i32>} : memref<1x16x16xf32, #tpu.memory_space<vmem>>, vector<1x16x16xf32>,
    return
  }
  func.func @transform_0(%arg0: i32) -> (i32, i32, i32) {
    %c0_i32 = arith.constant 0 : i32
    %c0_i32_0 = arith.constant 0 : i32
    %c0_i32_1 = arith.constant 0 : i32
    return %arg0, %c0_i32, %c0_i32_0 : i32, i32, i32
  }
  func.func @transform_1(%arg0: i32) -> (i32, i32) {
    %c0_i32 = arith.constant 0 : i32
    %c0_i32_0 = arith.constant 0 : i32
    %c0_i32_1 = arith.constant 0 : i32
    return %c0_i32, %c0_i32_0 : i32, i32
  }
  func.func @transform_2(%arg0: i32) -> (i32, i32) {
    %c0_i32 = arith.constant 0 : i32
    %c0_i32_0 = arith.constant 0 : i32
    %c0_i32_1 = arith.constant 0 : i32
    return %c0_i32, %c0_i32_0 : i32, i32
  }
  func.func @transform_3(%arg0: i32) -> (i32, i32) {
    %c0_i32 = arith.constant 0 : i32
    %c0_i32_0 = arith.constant 0 : i32
    %c0_i32_1 = arith.constant 0 : i32
    return %c0_i32, %c0_i32_0 : i32, i32
  }
  func.func @transform_4(%arg0: i32) -> (i32, i32) {
    %c0_i32 = arith.constant 0 : i32
    %c0_i32_0 = arith.constant 0 : i32
    %c0_i32_1 = arith.constant 0 : i32
    return %c0_i32, %c0_i32_0 : i32, i32
  }
  func.func @transform_5(%arg0: i32) -> (i32, i32) {
    %c0_i32 = arith.constant 0 : i32
    %c0_i32_0 = arith.constant 0 : i32
    %c0_i32_1 = arith.constant 0 : i32
    return %c0_i32, %c0_i32_0 : i32, i32
  }
  func.func @transform_6(%arg0: i32) -> (i32, i32) {
    %c0_i32 = arith.constant 0 : i32
    %c0_i32_0 = arith.constant 0 : i32
    %c0_i32_1 = arith.constant 0 : i32
    return %c0_i32, %c0_i32_0 : i32, i32
  }
  func.func @transform_7(%arg0: i32) -> (i32, i32) {
    %c0_i32 = arith.constant 0 : i32
    %c0_i32_0 = arith.constant 0 : i32
    %c0_i32_1 = arith.constant 0 : i32
    return %c0_i32, %c0_i32_0 : i32, i32
  }
  func.func @transform_8(%arg0: i32) -> (i32, i32) {
    %c0_i32 = arith.constant 0 : i32
    %c0_i32_0 = arith.constant 0 : i32
    %c0_i32_1 = arith.constant 0 : i32
    return %c0_i32, %c0_i32_0 : i32, i32
  }
  func.func @transform_9(%arg0: i32) -> (i32, i32, i32) {
    %c0_i32 = arith.constant 0 : i32
    %c0_i32_0 = arith.constant 0 : i32
    %c0_i32_1 = arith.constant 0 : i32
    return %arg0, %c0_i32, %c0_i32_0 : i32, i32, i32
  }
  func.func @transform_10(%arg0: i32) -> (i32, i32, i32) {
    %c0_i32 = arith.constant 0 : i32
    %c0_i32_0 = arith.constant 0 : i32
    %c0_i32_1 = arith.constant 0 : i32
    return %arg0, %c0_i32, %c0_i32_0 : i32, i32, i32
  }
}

</mosaic_0001>

<bundles_post_ra>
// kernel: encoder_forward.2
= control target key start
LH: loop header
LB: loop body
LE: loop exit
PB: predicated region body
PF: predicated region fallthrough
CT: control target
= control target key end

     0   :  { %s1190_s13 = smov 0   ;;  %s1425_s0 = inlined_call_operand.vmem [shape: f32[2,4,256], index: 0, kind: input, shape index: {}]   ;;  %s1426_s1 = inlined_call_operand.vmem [shape: bf16[8,36], index: 1, kind: input, shape index: {}]   ;;  %s1427_s2 = inlined_call_operand.vmem [shape: f32[8,1], index: 2, kind: input, shape index: {}]   ;;  %s1428_s3 = inlined_call_operand.vmem [shape: f32[8,1], index: 3, kind: input, shape index: {}]   ;;  %s1429_s4 = inlined_call_operand.vmem [shape: bf16[8,72], index: 4, kind: input, shape index: {}]   ;;  %s1430_s5 = inlined_call_operand.vmem [shape: f32[8,1], index: 5, kind: input, shape index: {}]   ;;  %s1431_s6 = inlined_call_operand.vmem [shape: f32[8,1], index: 6, kind: input, shape index: {}]   ;;  %s1432_s7 = inlined_call_operand.vmem [shape: f32[2,256], index: 7, kind: input, shape index: {}]   ;;  %s1433_s8 = inlined_call_operand.vmem [shape: f32[256,64], index: 8, kind: input, shape index: {}]   ;;  %s1434_s9 = inlined_call_operand.vmem [shape: f32[2,4,256], index: 9, kind: output, shape index: {0}]   ;;  %s1435_s10 = inlined_call_operand.vmem [shape: f32[2,8,64], index: 10, kind: output, shape index: {1}]  }
   0x1 LB: > { %s944_s14 = sadd.s32 4294967295, %s1127_s13   ;;  %p948_p0 = scmp.ge.s32.totalorder %s1127_s13, 1  ;;  %s1127_s13 = sphi %s1190_s13, %s21_s13  }
   0x2   : > { %p315_p1 = scmp.lt.s32.totalorder %s1127_s13, 3 }
   0x4   : > { %p316_p2 = pnand %p948_p0, %p315_p1 }
   0x5   : > { %p357_p3 = scmp.lt.s32.totalorder (!%p316_p2), %s944_s14, 1  ;;  %s1129_s19 = smov (!%p316_p2), 127   ;;  %v391_v2 = vlaneseq (!%p316_p2)  ;;  %v373_v5 = vld [vmem:[%s1432_s7] ss:$2 sm:$0x3] (!%p316_p2)  ;;  %vm385_vm0 = vcmask (!%p316_p2), 7168  }
   0x6   : > { %319 = sbr.rel (%p316_p2) target bundleno = 1821 (0x71d), region = 56  ;;  %s1130_s20 = smov (!%p316_p2), 1   ;;  %v954_v8 = vld [vmem:[%s1432_s7 + $0x1] ss:$2 sm:$0x3] (!%p316_p2)  ;;  %vm407_vm1 = vcmask (!%p316_p2), 1039360  }
   0x7   : > { %v392_v3 = vshrl.u32 (!%p316_p2), %v391_v2, 7  ;;  %vm427_vm2 = vcmask (!%p316_p2), 1043456   ;;  %s1131_s25 = smov (!%p316_p2), 16   ;;  %v1132_v35 = vmov (!%p316_p2), 0   ;;  %s1133_s26 = smov (!%p316_p2), 112   ;;  %vm442_vm3 = vcmask (!%p316_p2), 130048  }
   0x8   : > { %529 = vmatprep.mubr.bf16.mxu1 (!%p316_p2), %v1132_v35  ;;  %1083 = vset.pattern.permute.xlu0 (!%p316_p2), %v1132_v35  ;;  %vm1239_vm4 = vmneg (!%p316_p2), %vm442_vm3  ;;  %vm459_vm5 = vcmask (!%p316_p2), 916480   ;;  %vm1134_vm6 = vmmov (!%p316_p2), 1   ;;  %vm490_vm9 = vcmask (!%p316_p2), 1041408   ;;  %vm486_vm10 = vcmask (!%p316_p2), 293888  }
   0x9   : > { %v393_v4 = vsub.s32 (!%p316_p2), 0, %v392_v3  ;;  %v397_v7 = vsub.s32 (!%p316_p2), 1, %v392_v3  ;;  %1084 = vset.pattern.permute.xlu1 (!%p316_p2), %v1132_v35  ;;  %vm1250_vm7 = vmpackc.low (!%p316_p2), %vm1134_vm6, %vm1239_vm4  ;;  %vm662_vm15 = vcmask (!%p316_p2), 588800  }
   0xa   : > { %vm959_vm8 = vmpackc.low (!%p316_p2), %vm459_vm5, %vm1134_vm6 }
   0xb   : > { %v1211_v6 = vrot.slane (!%p316_p2), %v373_v5, %v393_v4  ;;  %v1218_v14 = vrot.slane (!%p316_p2), %v954_v8, %v393_v4  ;;  %v1220_v15 = vrot.slane (!%p316_p2), %v954_v8, %v397_v7  ;;  %v1222_v16 = vrot.slane (!%p316_p2), %v373_v5, %v397_v7  ;;  %v377_v8 = vld [vmem:[%s1427_s2] sm:$0xff] (!%p316_p2)  ;;  %vm966_vm13 = vmpackc.low (!%p316_p2), %vm1239_vm4, %vm1239_vm4 }
   0xc   : > { %vm973_vm14 = vmpackc.low (!%p316_p2), %vm459_vm5, %vm459_vm5 }
   0xd   : > { %s1441_s14 = smov (!%p357_p3, %s944_s14), 1 }
   0xe   : > { %s1198_s15 = sshll.u32 %s1441_s14, 3 }
   0xf   : > { %s361_s18 = scalar_lea.vmem %s1425_s0, %s1198_s15  ;;  %s366_s14 = scalar_lea.vmem %s1434_s9, %s1198_s15 }
  0x10   : > { %v372_v0 = vld [vmem:[%s361_s18] sm:$0xff]  ;;  %s370_s18 = scalar_lea.vmem %s1435_s10, %s1198_s15 }
  0x11   : > { %403 = vrot.lane.b32.xlu1 %v372_v0, %s1129_s19  ;;  %381 = vrot.lane.b32.xlu0 %v372_v0, %s1130_s20  ;;  %v380_v1 = vcombine.high %v372_v0, %v372_v0  ;;  %v425_v11 = vcombine.low %v372_v0, %v372_v0 }
  0x15   : > { %405 = vrot.lane.b32.xlu1 %v380_v1, %s1129_s19  ;;  %383 = vrot.lane.b32.xlu0 %v380_v1, %s1130_s20  ;;  %v376_v1 = vld [vmem:[%s1426_s1] sm:$0xf] }
  0x83   : > { %v404_v9 = vpop.permute.xlu1 %403  ;;  %v382_v10 = vpop.permute.xlu0 %381 }
  0x84   : > { %v389_v12 = vsel %vm385_vm0, 0.0, %v382_v10 }
  0x85   : > { %v401_v13 = vmul.f32 %v1211_v6, %v389_v12 }
  0x87   : > { %v406_v17 = vpop.permute.xlu1 %405  ;;  %v384_v18 = vpop.permute.xlu0 %383  ;;  %v428_v19 = vsel %vm427_vm2, %v401_v13, %v425_v11 }
  0x88   : > { %v408_v20 = vsel %vm407_vm1, %v404_v9, %v406_v17  ;;  %v411_v21 = vsel %vm407_vm1, %v406_v17, 0.0  ;;  %v386_v22 = vsel %vm385_vm0, %v382_v10, %v384_v18  ;;  %v468_v26 = vrot.slane %v428_v19, 4 }
  0x89   : > { %v423_v23 = vmul.f32 %v1218_v14, %v408_v20  ;;  %v424_v24 = vmul.f32 %v1220_v15, %v411_v21  ;;  %v402_v25 = vmul.f32 %v1222_v16, %v386_v22 }
  0x8b   : > { %v470_v27 = vrot.slane %v423_v23, 4  ;;  %v472_v28 = vrot.slane %v424_v24, 4  ;;  %v1063_v29 = vpack.i.bf16 %v424_v24, %v423_v23  ;;  %v429_v30 = vsel %vm427_vm2, %v402_v25, %v372_v0 }
  0x8c   : > { %v1068_v31 = vpack.i.bf16 %v429_v30, %v428_v19  ;;  %v469_v32 = vrot.slane %v429_v30, 4  ;;  %v378_v19 = vld [vmem:[%s1428_s3] sm:$0xff] }
  0x8d   : > { %1064 = vrot.lane.b32.xlu0 %v1063_v29, %s1131_s25  ;;  %v471_v33 = vsel %vm427_vm2, %v468_v26, %v470_v27 }
  0x8e   : > { %1069 = vrot.lane.b32.xlu1 %v1068_v31, %s1131_s25  ;;  %v473_v34 = vsel %vm427_vm2, %v469_v32, %v472_v28 }
  0x91   : > { %1074 = vrot.lane.b32.xlu0 %v1068_v31, %s1133_s26 }
  0x92   : > { %1079 = vrot.lane.b32.xlu1 %v1063_v29, %s1133_s26 }
  0xff   : > { %v1065_v36 = vpop.permute.xlu0 %1064 }
 0x100   : > { %v1067_v37 = vunpack.i.h.bf16 %v1065_v36  ;;  %v1066_v38 = vunpack.i.l.bf16 %v1065_v36  ;;  %v1070_v39 = vpop.permute.xlu1 %1069 }
 0x101   : > { %v1072_v40 = vunpack.i.h.bf16 %v1070_v39  ;;  %v1071_v41 = vunpack.i.l.bf16 %v1070_v39 }
 0x102   : > { %v450_v43 = vsel %vm442_vm3, 0.0, %v1066_v38  ;;  %v444_v44 = vsel %vm442_vm3, %v1066_v38, %v1067_v37 }
 0x103   : > { %v478_v45 = vsel %vm427_vm2, %v450_v43, %v468_v26  ;;  %v1075_v46 = vpop.permute.xlu0 %1074  ;;  %v443_v47 = vsel %vm442_vm3, %v1071_v41, %v1072_v40  ;;  %v479_v48 = vsel %vm427_vm2, %v444_v44, %v469_v32 }
 0x104   : > { %v957_v49 = vpack.c.bf16 %v478_v45, %v1071_v41  ;;  %v1077_v50 = vunpack.i.h.bf16 %v1075_v46  ;;  %v1076_v51 = vunpack.i.l.bf16 %v1075_v46  ;;  %v1080_v52 = vpop.permute.xlu1 %1079  ;;  %v481_v53 = vpack.c.bf16 %v479_v48, %v443_v47 }
 0x105   : > { %v1082_v55 = vunpack.i.h.bf16 %v1080_v52  ;;  %v1081_v56 = vunpack.i.l.bf16 %v1080_v52 }
 0x106   : > { %v960_v57 = vpack.c.bf16 %v1077_v50, %v473_v34  ;;  %497 = vmatprep.subr.bf16.mxu1 %v481_v53  ;;  %v460_v58 = vsel %vm459_vm5, %v1076_v51, %v1077_v50 }
 0x107   : > { %v467_v59 = vsel %vm459_vm5, %v1082_v55, 0.0  ;;  %958 = vmatpush1.bf16.msk.msra.mxu1 %vm1250_vm7, %v957_v49  ;;  %v461_v60 = vsel %vm459_vm5, %v1081_v56, %v1082_v55  ;;  %v482_v61 = vpack.c.bf16 %v460_v58, %v471_v33 }
 0x108   : > { %961 = vmatprep.subr.msk.bf16.mxu1 %vm959_vm8, %v960_v57  ;;  %v485_v62 = vpack.c.bf16 %v467_v59, %v467_v59  ;;  %v484_v63 = vpack.c.bf16 %v461_v60, %v461_v60 }
 0x10a   : > { %v492_v0 = vsel %vm490_vm9, %v484_v63, 0 }
 0x10b   : > { %500 = vmatpush1.bf16.msra.mxu1 %v482_v61 }
 0x10c   : > { %962 = vmatprep.subr.msk.bf16.mxu1 %vm490_vm9, %v485_v62 }
 0x10f   : > { %502 = vmatpush1.bf16.msra.mxu1 %v492_v0 }
 0x112   : > { %963 = vmatmul.mubr.msk.bf16.vlgmr.msra.gmra.mrb[0].mxu1 %vm486_vm10, %v376_v1 }
 0x113   : > { %704 = vmatprep.mubr.bf16.mxu1 %v1132_v35 }
 0x1e5   : > { %v531_v2 = vpop.f32.mrb[0].mxu1 }
 0x1e6   : > { %v533_v3 = vpop.f32.mrb[1].mxu1 }
 0x1e7   : > { %v535_v4 = vpop.f32.mrb[2].mxu1  ;;  %v538_v5 = vadd.f32 %v533_v3, %v531_v2 }
 0x1e8   : > { %v536_v7 = vpop.f32.mrb[3].mxu1 }
 0x1e9   : > { %539 = vadd.xlane.f32.xlu0 %v538_v5 }
 0x1ff   : > { %557 = vperm.xlu0 %1083, %v377_v8  }
 0x276   : > { %v540_v9 = vpop.xlane.xlu0 %539 }
 0x277   : > { %v542_v10 = vmul.f32 0.00390625, %v540_v9 }
 0x279   : > { %v543_v11 = vsub.f32 %v531_v2, %v542_v10  ;;  %v544_v12 = vsub.f32 %v533_v3, %v542_v10 }
 0x27b   : > { %v545_v13 = vmul.f32 %v543_v11, %v543_v11  ;;  %v546_v17 = vmul.f32 %v544_v12, %v544_v12 }
 0x27d   : > { %v547_v18 = vadd.f32 %v546_v17, %v545_v13 }
 0x27e   : > { %v558_v24 = vpop.permute.xlu0 %557 }
 0x27f   : > { %548 = vadd.xlane.f32.xlu1 %v547_v18 }
 0x290   : > { %564 = vperm.xlu1 %1084, %v378_v19  }
 0x30c   : > { %v549_v20 = vpop.xlane.xlu1 %548 }
 0x30d   : > { %v550_v21 = vmul.f32 0.00390625, %v549_v20 }
 0x30f   : > { %v551_v22 = vadd.f32 1e-05, %v550_v21 }
 0x310   : > { %v565_v27 = vpop.permute.xlu1 %564 }
 0x311   : > { %1117 = vrsqrt.f32 %v551_v22 }
 0x31b   : > { %v1118_v23 = vpop.eup %1117 }
 0x31c   : > { %v553_v25 = vmul.f32 %v1118_v23, %v543_v11  ;;  %v554_v26 = vmul.f32 %v1118_v23, %v544_v12  ;;  %v575_v23 = vld [vmem:[%s1429_s4] sm:$0xf] }
 0x31e   : > { %v560_v28 = vmul.f32 %v558_v24, %v553_v25  ;;  %v561_v29 = vmul.f32 %v558_v24, %v554_v26 }
 0x320   : > { %v567_v30 = vadd.f32 %v565_v27, %v560_v28  ;;  %v568_v31 = vadd.f32 %v565_v27, %v561_v29  ;;  %v576_v29 = vld [vmem:[%s1430_s5] sm:$0xff] }
 0x322   : > { %vm569_vm11 = vcmp.ge.f32.partialorder %v567_v30, 0.0  ;;  %v571_v32 = vmul.f32 0.01, %v567_v30  ;;  %v572_v33 = vmul.f32 0.01, %v568_v31  ;;  %vm570_vm12 = vcmp.ge.f32.partialorder %v568_v31, 0.0 }
 0x324   : > { %v1269_v34 = vsel %vm569_vm11, %v567_v30, %v571_v32  ;;  %v574_v35 = vsel %vm570_vm12, %v568_v31, %v572_v33  ;;  %v770_v30 = vld [vmem:[%s1433_s8 + $0x80] sm:$0xff]  ;;  %v771_v31 = vld [vmem:[%s1433_s8 + $0x88] sm:$0xff] }
 0x325   : > { %580 = vrot.lane.b32.xlu1 %v1269_v34, %s1130_s20  ;;  %v1090_v46 = vpack.i.bf16 %v574_v35, %v1269_v34  ;;  %v754_v32 = vld [vmem:[%s1433_s8] sm:$0xff]  ;;  %v1017_v33 = vpack.c.bf16 %v771_v31, %v770_v30 }
 0x327   : > { %1018 = vmatprep.subr.bf16.mxu0 %v1017_v33 }
 0x329   : > { %582 = vrot.lane.b32.xlu1 %v574_v35, %s1130_s20 }
 0x32d   : > { %590 = vrot.lane.b32.xlu1 %v1269_v34, %s1129_s19 }
 0x331   : > { %592 = vrot.lane.b32.xlu1 %v574_v35, %s1129_s19 }
 0x397   : > { %v581_v36 = vpop.permute.xlu1 %580 }
 0x398   : > { %v587_v37 = vsel %vm385_vm0, 0.0, %v581_v36 }
 0x399   : > { %v588_v40 = vmul.f32 %v587_v37, %v1211_v6 }
 0x39b   : > { %v583_v38 = vpop.permute.xlu1 %582 }
 0x39c   : > { %v584_v39 = vsel %vm385_vm0, %v581_v36, %v583_v38  ;;  %v773_v36 = vld [vmem:[%s1433_s8 + $0x98] sm:$0xff] }
 0x39d   : > { %v589_v41 = vmul.f32 %v584_v39, %v1222_v16  ;;  %v756_v39 = vld [vmem:[%s1433_s8 + $0x10] sm:$0xff] }
 0x39f   : > { %v591_v43 = vpop.permute.xlu1 %590  ;;  %v1085_v44 = vpack.i.bf16 %v589_v41, %v588_v40 }
 0x3a1   : > { %1086 = vrot.lane.b32.xlu1 %v1085_v44, %s1131_s25 }
 0x3a3   : > { %v593_v45 = vpop.permute.xlu1 %592 }
 0x3a4   : > { %v594_v47 = vsel %vm407_vm1, %v591_v43, %v593_v45  ;;  %v597_v48 = vsel %vm407_vm1, %v593_v45, 0.0 }
 0x3a5   : > { %v598_v49 = vmul.f32 %v594_v47, %v1218_v14  ;;  %v599_v50 = vmul.f32 %v597_v48, %v1220_v15  ;;  %1091 = vrot.lane.b32.xlu1 %v1090_v46, %s1131_s25 }
 0x3a7   : > { %v1095_v6 = vpack.i.bf16 %v599_v50, %v598_v49  ;;  %v657_v42 = vpack.c.bf16 %v599_v50, %v574_v35  ;;  %v656_v11 = vpack.c.bf16 %v598_v49, %v1269_v34  ;;  %v755_v34 = vld [vmem:[%s1433_s8 + $0x8] sm:$0xff]  ;;  %v772_v35 = vld [vmem:[%s1433_s8 + $0x90] sm:$0xff]  ;;  %v774_v50 = vld [vmem:[%s1433_s8 + $0xa0] sm:$0xff] }
 0x3a8   : > { %v1019_v37 = vpack.c.bf16 %v755_v34, %v754_v32  ;;  %v1021_v38 = vpack.c.bf16 %v773_v36, %v772_v35 }
 0x3a9   : > { %1106 = vrot.lane.b32.xlu1 %v1085_v44, %s1133_s26  ;;  %1096 = vrot.lane.b32.xlu0 %v1095_v6, %s1131_s25 }
 0x3aa   : > { %1020 = vmatpush3.bf16.msra.mxu0 %v1019_v37 }
 0x3ab   : > { %1022 = vmatprep.subr.bf16.mxu0 %v1021_v38 }
 0x3ad   : > { %1111 = vrot.lane.b32.xlu1 %v1095_v6, %s1133_s26  ;;  %1101 = vrot.lane.b32.xlu0 %v1090_v46, %s1133_s26  ;;  %v775_v6 = vld [vmem:[%s1433_s8 + $0xa8] sm:$0xff] }
 0x413   : > { %v1087_v16 = vpop.permute.xlu1 %1086 }
 0x414   : > { %v1089_v51 = vunpack.i.h.bf16 %v1087_v16  ;;  %v1088_v52 = vunpack.i.l.bf16 %v1087_v16  ;;  %v577_v16 = vld [vmem:[%s1431_s6] sm:$0xff] }
 0x416   : > { %v616_v14 = vsel %vm442_vm3, %v1088_v52, %v1089_v51  ;;  %v1025_v51 = vpack.c.bf16 %v775_v6, %v774_v50 }
 0x417   : > { %v1092_v53 = vpop.permute.xlu1 %1091 }
 0x418   : > { %v1094_v55 = vunpack.i.h.bf16 %v1092_v53  ;;  %v1093_v56 = vunpack.i.l.bf16 %v1092_v53  ;;  %v759_v53 = vld [vmem:[%s1433_s8 + $0x28] sm:$0xff] }
 0x41a   : > { %v617_v15 = vsel %vm442_vm3, %v1093_v56, %v1094_v55  ;;  %v967_v60 = vpack.c.bf16 %v1093_v56, %v1088_v52  ;;  %v758_v52 = vld [vmem:[%s1433_s8 + $0x20] sm:$0xff]  ;;  %v776_v56 = vld [vmem:[%s1433_s8 + $0xb0] sm:$0xff] }
 0x41b   : > { %v1097_v57 = vpop.permute.xlu0 %1096  ;;  %v1107_v58 = vpop.permute.xlu1 %1106  ;;  %v653_v59 = vpack.c.bf16 %v617_v15, %v616_v14  ;;  %v1027_v55 = vpack.c.bf16 %v759_v53, %v758_v52  ;;  %v777_v14 = vld [vmem:[%s1433_s8 + $0xb8] sm:$0xff] }
 0x41c   : > { %v1099_v61 = vunpack.i.h.bf16 %v1097_v57  ;;  %v1098_v62 = vunpack.i.l.bf16 %v1097_v57  ;;  %v1109_v9 = vunpack.i.h.bf16 %v1107_v58  ;;  %v1108_v10 = vunpack.i.l.bf16 %v1107_v58  ;;  %v760_v57 = vld [vmem:[%s1433_s8 + $0x30] sm:$0xff]  ;;  %v761_v58 = vld [vmem:[%s1433_s8 + $0x38] sm:$0xff] }
 0x41d   : > { %672 = vmatprep.subr.bf16.mxu1 %v653_v59  ;;  %v1029_v15 = vpack.c.bf16 %v777_v14, %v776_v56  ;;  %v1031_v59 = vpack.c.bf16 %v761_v58, %v760_v57 }
 0x41e   : > { %968 = vmatpush1.bf16.msk.msra.mxu1 %vm966_vm13, %v967_v60  ;;  %v618_v63 = vsel %vm442_vm3, %v1098_v62, %v1099_v61  ;;  %v971_v3 = vpack.c.bf16 %v588_v40, %v1098_v62  ;;  %v640_v19 = vsel %vm459_vm5, %v1108_v10, %v1109_v9  ;;  %v757_v40 = vld [vmem:[%s1433_s8 + $0x18] sm:$0xff]  ;;  %v778_v60 = vld [vmem:[%s1433_s8 + $0xc0] sm:$0xff]  ;;  %v779_v61 = vld [vmem:[%s1433_s8 + $0xc8] sm:$0xff] }
 0x41f   : > { %v1102_v0 = vpop.permute.xlu0 %1101  ;;  %v1112_v1 = vpop.permute.xlu1 %1111  ;;  %v655_v2 = vpack.c.bf16 %v589_v41, %v618_v63  ;;  %v1023_v41 = vpack.c.bf16 %v757_v40, %v756_v39  ;;  %v1033_v62 = vpack.c.bf16 %v779_v61, %v778_v60  ;;  %v762_v63 = vld [vmem:[%s1433_s8 + $0x40] sm:$0xff] }
 0x420   : > { %v1104_v4 = vunpack.i.h.bf16 %v1102_v0  ;;  %v1103_v5 = vunpack.i.l.bf16 %v1102_v0  ;;  %v1114_v7 = vunpack.i.h.bf16 %v1112_v1  ;;  %v1113_v8 = vunpack.i.l.bf16 %v1112_v1  ;;  %v763_v0 = vld [vmem:[%s1433_s8 + $0x48] sm:$0xff] }
 0x421   : > { %674 = vmatprep.subr.bf16.mxu1 %v655_v2  ;;  %1024 = vmatpush3.bf16.msra.mxu0 %v1023_v41  ;;  %v1035_v1 = vpack.c.bf16 %v763_v0, %v762_v63  ;;  %v780_v2 = vld [vmem:[%s1433_s8 + $0xd0] sm:$0xff] }
 0x422   : > { %972 = vmatpush1.bf16.msk.msra.mxu1 %vm1250_vm7, %v971_v3  ;;  %v641_v12 = vsel %vm459_vm5, %v1103_v5, %v1104_v4  ;;  %v974_v13 = vpack.c.bf16 %v1104_v4, %v1109_v9  ;;  %v651_v17 = vsel %vm459_vm5, %v1114_v7, 0.0  ;;  %v642_v18 = vsel %vm459_vm5, %v1113_v8, %v1114_v7  ;;  %1026 = vmatprep.subr.bf16.mxu0 %v1025_v51  ;;  %v781_v3 = vld [vmem:[%s1433_s8 + $0xd8] sm:$0xff]  ;;  %v764_v5 = vld [vmem:[%s1433_s8 + $0x50] sm:$0xff]  ;;  %v782_v8 = vld [vmem:[%s1433_s8 + $0xe0] sm:$0xff] }
 0x423   : > { %676 = vmatprep.subr.bf16.mxu1 %v657_v42  ;;  %v658_v54 = vpack.c.bf16 %v641_v12, %v640_v19  ;;  %v661_v20 = vpack.c.bf16 %v651_v17, %v651_v17  ;;  %v660_v21 = vpack.c.bf16 %v642_v18, %v642_v18  ;;  %v1037_v4 = vpack.c.bf16 %v781_v3, %v780_v2  ;;  %v765_v42 = vld [vmem:[%s1433_s8 + $0x58] sm:$0xff]  ;;  %v783_v9 = vld [vmem:[%s1433_s8 + $0xe8] sm:$0xff]  ;;  %v784_v17 = vld [vmem:[%s1433_s8 + $0xf0] sm:$0xff] }
 0x424   : > { %v1039_v7 = vpack.c.bf16 %v765_v42, %v764_v5  ;;  %v1041_v10 = vpack.c.bf16 %v783_v9, %v782_v8  ;;  %v767_v12 = vld [vmem:[%s1433_s8 + $0x68] sm:$0xff]  ;;  %v785_v18 = vld [vmem:[%s1433_s8 + $0xf8] sm:$0xff] }
 0x425   : > { %v667_v22 = vsel %vm427_vm2, %v660_v21, 0  ;;  %1028 = vmatpush3.bf16.msra.mxu0 %v1027_v55  ;;  %v1045_v19 = vpack.c.bf16 %v785_v18, %v784_v17 }
 0x426   : > { %677 = vmatpush1.bf16.msra.mxu1 %v656_v11  ;;  %1030 = vmatprep.subr.bf16.mxu0 %v1029_v15  ;;  %v766_v11 = vld [vmem:[%s1433_s8 + $0x60] sm:$0xff] }
 0x427   : > { %975 = vmatprep.subr.msk.bf16.mxu1 %vm973_vm14, %v974_v13  ;;  %v1043_v13 = vpack.c.bf16 %v767_v12, %v766_v11 }
 0x429   : > { %1032 = vmatpush3.bf16.msra.mxu0 %v1031_v59 }
 0x42a   : > { %679 = vmatpush1.bf16.msra.mxu1 %v658_v54  ;;  %1034 = vmatprep.subr.bf16.mxu0 %v1033_v62  ;;  %v768_v54 = vld [vmem:[%s1433_s8 + $0x70] sm:$0xff] }
 0x42b   : > { %976 = vmatprep.subr.msk.bf16.mxu1 %vm427_vm2, %v661_v20  ;;  %v769_v20 = vld [vmem:[%s1433_s8 + $0x78] sm:$0xff]  ;;  %vm856_vm2 = vcmask 523264  }
 0x42c   : > { %v1047_v21 = vpack.c.bf16 %v769_v20, %v768_v54 }
 0x42d   : > { %1036 = vmatpush3.bf16.msra.mxu0 %v1035_v1 }
 0x42e   : > { %681 = vmatpush1.bf16.msra.mxu1 %v667_v22  ;;  %1038 = vmatprep.subr.bf16.mxu0 %v1037_v4 }
 0x431   : > { %977 = vmatmul.mubr.msk.bf16.vlgmr.msra.gmra.mrb[4].mxu1 %vm662_vm15, %v575_v23  ;;  %1040 = vmatpush3.bf16.msra.mxu0 %v1039_v7 }
 0x432   : > { %1042 = vmatprep.subr.bf16.mxu0 %v1041_v10 }
 0x435   : > { %1044 = vmatpush3.bf16.msra.mxu0 %v1043_v13 }
 0x436   : > { %1046 = vmatprep.subr.bf16.mxu0 %v1045_v19 }
 0x439   : > { %1048 = vmatpush3.bf16.msra.mxu0 %v1047_v21 }
 0x504   : > { %v706_v24 = vpop.f32.mrb[4].mxu1 }
 0x505   : > { %v708_v25 = vpop.f32.mrb[5].mxu1 }
 0x506   : > { %v710_v26 = vpop.f32.mrb[6].mxu1  ;;  %v713_v27 = vadd.f32 %v708_v25, %v706_v24 }
 0x507   : > { %v711_v28 = vpop.f32.mrb[7].mxu1 }
 0x508   : > { %714 = vadd.xlane.f32.xlu0 %v713_v27 }
 0x51e   : > { %731 = vperm.xlu0 %1083, %v576_v29  }
 0x595   : > { %v715_v43 = vpop.xlane.xlu0 %714 }
 0x596   : > { %v716_v44 = vmul.f32 0.00390625, %v715_v43 }
 0x598   : > { %v717_v45 = vsub.f32 %v706_v24, %v716_v44  ;;  %v718_v46 = vsub.f32 %v708_v25, %v716_v44 }
 0x59a   : > { %v719_v47 = vmul.f32 %v717_v45, %v717_v45  ;;  %v720_v48 = vmul.f32 %v718_v46, %v718_v46 }
 0x59c   : > { %v721_v49 = vadd.f32 %v720_v48, %v719_v47 }
 0x59d   : > { %v732_v28 = vpop.permute.xlu0 %731 }
 0x59e   : > { %722 = vadd.xlane.f32.xlu1 %v721_v49 }
 0x5af   : > { %738 = vperm.xlu1 %1084, %v577_v16  }
 0x62b   : > { %v723_v22 = vpop.xlane.xlu1 %722 }
 0x62c   : > { %v724_v23 = vmul.f32 0.00390625, %v723_v22 }
 0x62e   : > { %v725_v24 = vadd.f32 1e-05, %v724_v23 }
 0x62f   : > { %v739_v31 = vpop.permute.xlu1 %738 }
 0x630   : > { %1119 = vrsqrt.f32 %v725_v24 }
 0x63a   : > { %v1120_v25 = vpop.eup %1119 }
 0x63b   : > { %v727_v26 = vmul.f32 %v1120_v25, %v717_v45  ;;  %v728_v27 = vmul.f32 %v1120_v25, %v718_v46 }
 0x63d   : > { %v734_v29 = vmul.f32 %v732_v28, %v727_v26  ;;  %v735_v30 = vmul.f32 %v732_v28, %v728_v27 }
 0x63f   : > { %v741_v32 = vadd.f32 %v739_v31, %v734_v29  ;;  %v742_v33 = vadd.f32 %v739_v31, %v735_v30 }
 0x641   : > { %v745_v34 = vmul.f32 0.01, %v741_v32  ;;  %vm743_vm0 = vcmp.ge.f32.partialorder %v741_v32, 0.0  ;;  %vm744_vm1 = vcmp.ge.f32.partialorder %v742_v33, 0.0  ;;  %v746_v35 = vmul.f32 0.01, %v742_v33 }
 0x643   : > { %v747_v36 = vsel %vm743_vm0, %v741_v32, %v745_v34  ;;  %v748_v37 = vsel %vm744_vm1, %v742_v33, %v746_v35 }
 0x644   : > { %v751_v38 = vcombine.low %v747_v36, %v748_v37  ;;  %850 = vmatprep.mubr.f32.mxu0 %v748_v37 }
 0x645   : > { %851 = vmatmul.mubr.f32.vlgmr.msra.gmra.mrb[0].mxu0 %v747_v36 }
 0x646   : > { %753 = vst [vmem:[%s366_s14] sm:$0xff] %v751_v38 }
 0x718   : > { %v1014_v39 = vpop.f32.mrb[0].mxu0 }
 0x719   : > { %v1015_v40 = vpop.f32.mrb[1].mxu0 }
 0x71a   : > { %v1016_v41 = vadd.f32 %v1015_v40, %v1014_v39 }
 0x71c   : > { %857 = vst.msk [vmem:[%s370_s18] sm:$0xff] %vm856_vm2, %v1016_v41 }
 0x71d PF: > { %s21_s13 = sadd.s32 1, %s1127_s13  }
 0x71e   : > { %p18_p4 = scmp.ge.s32.totalorder %s21_s13, 4  }
 0x720   :  { %20 = sbr.rel (!%p18_p4) target bundleno = 1 (0x1), region = 99 }

// kernel: encoder_forward.3
= control target key start
LH: loop header
LB: loop body
LE: loop exit
PB: predicated region body
PF: predicated region fallthrough
CT: control target
= control target key end

     0   :  { %s1184_s13 = smov 0   ;;  %s1356_s0 = inlined_call_operand.vmem [shape: f32[2,8,64], index: 0, kind: input, shape index: {}]   ;;  %s1357_s1 = inlined_call_operand.vmem [shape: bf16[16,72], index: 1, kind: input, shape index: {}]   ;;  %s1358_s2 = inlined_call_operand.vmem [shape: f32[16,1], index: 2, kind: input, shape index: {}]   ;;  %s1359_s3 = inlined_call_operand.vmem [shape: f32[16,1], index: 3, kind: input, shape index: {}]   ;;  %s1360_s4 = inlined_call_operand.vmem [shape: bf16[16,144], index: 4, kind: input, shape index: {}]   ;;  %s1361_s5 = inlined_call_operand.vmem [shape: f32[16,1], index: 5, kind: input, shape index: {}]   ;;  %s1362_s6 = inlined_call_operand.vmem [shape: f32[16,1], index: 6, kind: input, shape index: {}]   ;;  %s1363_s7 = inlined_call_operand.vmem [shape: f32[2,64], index: 7, kind: input, shape index: {}]   ;;  %s1364_s8 = inlined_call_operand.vmem [shape: f32[64,16], index: 8, kind: input, shape index: {}]   ;;  %s1365_s9 = inlined_call_operand.vmem [shape: f32[2,8,64], index: 9, kind: output, shape index: {0}]   ;;  %s1366_s10 = inlined_call_operand.vmem [shape: f32[2,16,16], index: 10, kind: output, shape index: {1}]  }
   0x1 LB: > { %s921_s14 = sadd.s32 4294967295, %s1119_s13   ;;  %p925_p0 = scmp.ge.s32.totalorder %s1119_s13, 1  ;;  %s1119_s13 = sphi %s1184_s13, %s21_s13  }
   0x2   : > { %p314_p1 = scmp.lt.s32.totalorder %s1119_s13, 3 }
   0x4   : > { %p315_p2 = pnand %p925_p0, %p314_p1 }
   0x5   : > { %p355_p3 = scmp.lt.s32.totalorder (!%p315_p2), %s921_s14, 1  ;;  %s1121_s19 = smov (!%p315_p2), 1   ;;  %v1123_v1 = vmov (!%p315_p2), 0.0   ;;  %vm382_vm0 = vcmask (!%p315_p2), 7168   ;;  %v1205_v2 = vld [vmem:[%s1363_s7] ss:$0 sm:$0xff] (!%p315_p2) }
   0x6   : > { %318 = sbr.rel (%p315_p2) target bundleno = 1827 (0x723), region = 56  ;;  %s1122_s20 = smov (!%p315_p2), 127   ;;  %994 = vmatprep.subr.bf16.mxu0 (!%p315_p2), %v1123_v1  ;;  %vm392_vm1 = vcmask (!%p315_p2), 515072   ;;  %v1212_v6 = vld [vmem:[%s1363_s7 + $0x1] ss:$0 sm:$0xff] (!%p315_p2)  ;;  %vm1126_vm2 = vmmov (!%p315_p2), 0  }
   0x7   : > { %s1124_s25 = smov (!%p315_p2), 120   ;;  %s1125_s26 = smov (!%p315_p2), 8   ;;  %1004 = vmatprep.mubr.msk.bf16.mxu0 (!%p315_p2), %vm1126_vm2, %v1123_v1  ;;  %vm410_vm3 = vcmask (!%p315_p2), 64512   ;;  %vm1127_vm6 = vmmov (!%p315_p2), 1   ;;  %vm423_vm8 = vcmask (!%p315_p2), 457728   ;;  %vm441_vm10 = vcmask (!%p315_p2), 1043456  }
   0x8   : > { %vm933_vm4 = vmneg (!%p315_p2), %vm410_vm3  ;;  %v1101_v28 = vld [vmem:[%s1357_s1] sm:$0xff] (!%p315_p2)   ;;  %vm437_vm11 = vcmask (!%p315_p2), 588800   ;;  %vm486_vm12 = vcmask (!%p315_p2), 523264   ;;  %v1128_v36 = vmov (!%p315_p2), 0   ;;  %v377_v38 = vld [vmem:[%s1359_s3 + $0x8] sm:$0xff] (!%p315_p2)  ;;  %vm642_vm15 = vcmask (!%p315_p2), 130048  }
   0x9   : > { %vm1220_vm5 = vmpackc.low (!%p315_p2), %vm933_vm4, %vm933_vm4  ;;  %v374_v35 = vld [vmem:[%s1358_s2] sm:$0xff] (!%p315_p2)  ;;  %1069 = vset.pattern.permute.xlu1 (!%p315_p2), %v1128_v36  ;;  %1070 = vset.pattern.permute.xlu0 (!%p315_p2), %v1128_v36  ;;  %v375_v49 = vld [vmem:[%s1358_s2 + $0x8] sm:$0xff] (!%p315_p2) }
   0xa   : > { %vm939_vm7 = vmpackc.low (!%p315_p2), %vm1127_vm6, %vm933_vm4  ;;  %646 = vmatprep.subr.bf16.mxu1 (!%p315_p2), %v1128_v36  ;;  %v376_v37 = vld [vmem:[%s1359_s3] sm:$0xff] (!%p315_p2) }
   0xb   : > { %vm1226_vm9 = vmpackc.low (!%p315_p2), %vm423_vm8, %vm423_vm8  ;;  %v548_v24 = vld [vmem:[%s1362_s6] sm:$0xff] (!%p315_p2) }
   0xd   : > { %s1372_s14 = smov (!%p355_p3, %s921_s14), 1 }
   0xe   : > { %s926_s15 = sshll.u32 %s1372_s14, 3  ;;  %s977_s17 = sshll.u32 %s1372_s14, 4 }
   0xf   : > { %s358_s18 = scalar_lea.vmem %s1356_s0, %s926_s15  ;;  %s362_s16 = scalar_lea.vmem %s1365_s9, %s926_s15 }
  0x10   : > { %v369_v0 = vld [vmem:[%s358_s18] sm:$0xff] }
  0x11   : > { %379 = vrot.lane.b32.xlu0 %v369_v0, %s1121_s19 }
  0x15   : > { %389 = vrot.lane.b32.xlu0 %v369_v0, %s1122_s20 }
  0x83   : > { %v380_v3 = vpop.permute.xlu0 %379 }
  0x84   : > { %v383_v4 = vsel %vm382_vm0, 0.0, %v380_v3 }
  0x85   : > { %v388_v5 = vmul.f32 %v1205_v2, %v383_v4 }
  0x87   : > { %v1064_v7 = vpack.i.bf16 %v369_v0, %v388_v5  ;;  %v390_v8 = vpop.permute.xlu0 %389 }
  0x88   : > { %v393_v9 = vsel %vm392_vm1, %v390_v8, 0.0 }
  0x89   : > { %1065 = vrot.lane.b32.xlu0 %v1064_v7, %s1124_s25  ;;  %1060 = vrot.lane.b32.xlu1 %v1064_v7, %s1125_s26  ;;  %v398_v10 = vmul.f32 %v1212_v6, %v393_v9 }
  0x8b   : > { %v429_v22 = vpack.c.bf16 %v398_v10, %v369_v0 }
  0x8d   : > { %405 = vrot.lane.b32.xlu1 %v398_v10, %s1125_s26 }
  0x91   : > { %418 = vrot.lane.b32.xlu1 %v398_v10, %s1124_s25 }
  0xfb   : > { %v1061_v11 = vpop.permute.xlu1 %1060  ;;  %v1066_v18 = vpop.permute.xlu0 %1065 }
  0xfc   : > { %v1063_v12 = vunpack.i.h.bf16 %v1061_v11  ;;  %v1062_v13 = vunpack.i.l.bf16 %v1061_v11  ;;  %v1068_v20 = vunpack.i.h.bf16 %v1066_v18  ;;  %v1067_v21 = vunpack.i.l.bf16 %v1066_v18 }
  0xfe   : > { %v936_v15 = vpack.c.bf16 %v1063_v12, %v1062_v13  ;;  %v943_v25 = vpack.c.bf16 %v1068_v20, %v1067_v21 }
  0xff   : > { %v406_v16 = vpop.permute.xlu1 %405 }
 0x100   : > { %995 = vmatpush3.bf16.msk.msra.mxu0 %vm1220_vm5, %v936_v15  ;;  %v940_v17 = vpack.c.bf16 %v388_v5, %v406_v16 }
 0x101   : > { %996 = vmatprep.subr.bf16.mxu0 %v1123_v1 }
 0x103   : > { %v419_v19 = vpop.permute.xlu1 %418 }
 0x104   : > { %997 = vmatpush3.bf16.msk.msra.mxu0 %vm939_vm7, %v940_v17  ;;  %v426_v23 = vsel %vm423_vm8, %v419_v19, 0.0 }
 0x105   : > { %998 = vmatprep.subr.bf16.mxu0 %v1123_v1  ;;  %v431_v26 = vpack.c.bf16 %v426_v23, %v426_v23 }
 0x107   : > { %v443_v27 = vsel %vm441_vm10, %v431_v26, 0 }
 0x108   : > { %999 = vmatpush3.bf16.msra.mxu0 %v429_v22 }
 0x109   : > { %1000 = vmatprep.subr.bf16.mxu0 %v1123_v1 }
 0x10c   : > { %1001 = vmatpush3.bf16.msk.msra.mxu0 %vm1226_vm9, %v943_v25 }
 0x10d   : > { %1002 = vmatprep.subr.bf16.mxu0 %v1123_v1 }
 0x110   : > { %1003 = vmatpush3.bf16.msra.mxu0 %v443_v27 }
 0x113   : > { %1005 = vmatmul.mubr.msk.bf16.vlgmr.msra.gmra.mrb[0].mxu0 %vm437_vm11, %v1101_v28 }
 0x1e6   : > { %v479_v29 = vpop.f32.mrb[0].mxu0 }
 0x1e7   : > { %v1006_v30 = vpop.f32.mrb[1].mxu0  ;;  %v487_v31 = vsel %vm486_vm12, %v479_v29, 0.0 }
 0x1e8   : > { %488 = vadd.xlane.f32.xlu0 %v487_v31  ;;  %v482_v32 = vpop.f32.mrb[2].mxu0 }
 0x1e9   : > { %v1007_v33 = vpop.f32.mrb[3].mxu0  ;;  %v490_v34 = vsel %vm486_vm12, %v482_v32, 0.0 }
 0x1ea   : > { %491 = vadd.xlane.f32.xlu1 %v490_v34 }
 0x1fb   : > { %516 = vperm.xlu1 %1069, %v374_v35  }
 0x1ff   : > { %528 = vperm.xlu1 %1069, %v376_v37  }
 0x203   : > { %533 = vperm.xlu1 %1069, %v377_v38  }
 0x275   : > { %v489_v39 = vpop.xlane.xlu0 %488 }
 0x276   : > { %v494_v40 = vmul.f32 0.015625, %v489_v39 }
 0x277   : > { %v492_v41 = vpop.xlane.xlu1 %491 }
 0x278   : > { %v496_v42 = vsub.f32 %v479_v29, %v494_v40  ;;  %v495_v43 = vmul.f32 0.015625, %v492_v41 }
 0x27a   : > { %v497_v44 = vsub.f32 %v482_v32, %v495_v43  ;;  %v498_v45 = vmul.f32 %v496_v42, %v496_v42 }
 0x27b   : > { %v517_v56 = vpop.permute.xlu1 %516 }
 0x27c   : > { %v500_v46 = vsel %vm486_vm12, %v498_v45, 0.0  ;;  %v499_v47 = vmul.f32 %v497_v44, %v497_v44 }
 0x27d   : > { %501 = vadd.xlane.f32.xlu0 %v500_v46 }
 0x27e   : > { %v503_v48 = vsel %vm486_vm12, %v499_v47, 0.0 }
 0x27f   : > { %v529_v59 = vpop.permute.xlu1 %528 }
 0x281   : > { %504 = vadd.xlane.f32.xlu0 %v503_v48 }
 0x283   : > { %v534_v4 = vpop.permute.xlu1 %533 }
 0x297   : > { %521 = vperm.xlu0 %1070, %v375_v49  }
 0x30a   : > { %v502_v50 = vpop.xlane.xlu0 %501 }
 0x30b   : > { %v506_v51 = vmul.f32 0.015625, %v502_v50 }
 0x30d   : > { %v508_v52 = vadd.f32 1e-05, %v506_v51 }
 0x30e   : > { %v505_v53 = vpop.xlane.xlu0 %504 }
 0x30f   : > { %1105 = vrsqrt.f32 %v508_v52  ;;  %v507_v54 = vmul.f32 0.015625, %v505_v53  ;;  %v1102_v53 = vld [vmem:[%s1360_s4] ss:$8 sps:$4 sm:$0xff]  }
 0x311   : > { %v509_v55 = vadd.f32 1e-05, %v507_v54 }
 0x313   : > { %1107 = vrsqrt.f32 %v509_v55 }
 0x316   : > { %v522_v62 = vpop.permute.xlu0 %521 }
 0x319   : > { %v1106_v57 = vpop.eup %1105 }
 0x31a   : > { %v512_v58 = vmul.f32 %v1106_v57, %v496_v42 }
 0x31c   : > { %v524_v60 = vmul.f32 %v517_v56, %v512_v58 }
 0x31d   : > { %v1108_v61 = vpop.eup %1107 }
 0x31e   : > { %v536_v63 = vadd.f32 %v529_v59, %v524_v60  ;;  %v513_v0 = vmul.f32 %v1108_v61, %v497_v44  ;;  %v549_v60 = vld [vmem:[%s1362_s6 + $0x8] sm:$0xff] }
 0x320   : > { %vm538_vm13 = vcmp.ge.f32.partialorder %v536_v63, 0.0  ;;  %v540_v1 = vmul.f32 0.01, %v536_v63  ;;  %v525_v3 = vmul.f32 %v522_v62, %v513_v0 }
 0x322   : > { %v542_v5 = vsel %vm538_vm13, %v536_v63, %v540_v1  ;;  %v537_v7 = vadd.f32 %v534_v4, %v525_v3 }
 0x323   : > { %552 = vrot.lane.b32.xlu1 %v542_v5, %s1121_s19 }
 0x324   : > { %vm539_vm14 = vcmp.ge.f32.partialorder %v537_v7, 0.0  ;;  %v541_v8 = vmul.f32 0.01, %v537_v7 }
 0x326   : > { %v543_v9 = vsel %vm539_vm14, %v537_v7, %v541_v8 }
 0x327   : > { %554 = vrot.lane.b32.xlu1 %v543_v9, %s1121_s19  ;;  %v1076_v10 = vpack.i.bf16 %v543_v9, %v542_v5  ;;  %v628_v11 = vpack.c.bf16 %v543_v9, %v542_v5  ;;  %s367_s19 = scalar_lea.vmem %s1366_s10, %s977_s17 }
 0x32b   : > { %562 = vrot.lane.b32.xlu1 %v542_v5, %s1122_s20 }
 0x32f   : > { %564 = vrot.lane.b32.xlu1 %v543_v9, %s1122_s20  ;;  %v547_v9 = vld [vmem:[%s1361_s5 + $0x8] sm:$0xff] }
 0x395   : > { %v553_v12 = vpop.permute.xlu1 %552 }
 0x396   : > { %v558_v13 = vsel %vm382_vm0, 0.0, %v553_v12 }
 0x397   : > { %v560_v17 = vmul.f32 %v1205_v2, %v558_v13  ;;  %v746_v13 = vld [vmem:[%s1364_s8 + $0x10] sm:$0xff] }
 0x399   : > { %v555_v15 = vpop.permute.xlu1 %554 }
 0x39a   : > { %v559_v16 = vsel %vm382_vm0, 0.0, %v555_v15  ;;  %v747_v15 = vld [vmem:[%s1364_s8 + $0x18] sm:$0xff] }
 0x39b   : > { %v561_v18 = vmul.f32 %v1205_v2, %v559_v16  ;;  %v1104_v2 = vld [vmem:[%s1360_s4 + $0x4] ss:$8 sps:$4 sm:$0xff]   ;;  %v1031_v16 = vpack.c.bf16 %v747_v15, %v746_v13 }
 0x39c   : > { %972 = vmatprep.mubr.msk.bf16.mxu1 %vm642_vm15, %v1104_v2 }
 0x39d   : > { %v563_v19 = vpop.permute.xlu1 %562  ;;  %v1071_v20 = vpack.i.bf16 %v561_v18, %v560_v17  ;;  %v627_v21 = vpack.c.bf16 %v561_v18, %v560_v17  ;;  %v748_v17 = vld [vmem:[%s1364_s8 + $0x20] sm:$0xff]  ;;  %v749_v18 = vld [vmem:[%s1364_s8 + $0x28] sm:$0xff] }
 0x39e   : > { %v568_v22 = vsel %vm392_vm1, %v563_v19, 0.0  ;;  %v1035_v19 = vpack.c.bf16 %v749_v18, %v748_v17 }
 0x39f   : > { %1072 = vrot.lane.b32.xlu1 %v1071_v20, %s1125_s26  ;;  %v570_v26 = vmul.f32 %v1212_v6, %v568_v22 }
 0x3a1   : > { %v565_v23 = vpop.permute.xlu1 %564 }
 0x3a2   : > { %v569_v25 = vsel %vm392_vm1, %v565_v23, 0.0 }
 0x3a3   : > { %v571_v27 = vmul.f32 %v1212_v6, %v569_v25  ;;  %1077 = vrot.lane.b32.xlu1 %v1076_v10, %s1125_s26 }
 0x3a5   : > { %v1081_v28 = vpack.i.bf16 %v571_v27, %v570_v26  ;;  %v629_v29 = vpack.c.bf16 %v571_v27, %v570_v26 }
 0x3a7   : > { %1087 = vrot.lane.b32.xlu1 %v1071_v20, %s1124_s25  ;;  %1082 = vrot.lane.b32.xlu0 %v1081_v28, %s1125_s26  ;;  %v750_v20 = vld [vmem:[%s1364_s8 + $0x30] sm:$0xff] }
 0x3ab   : > { %1097 = vrot.lane.b32.xlu1 %v1081_v28, %s1124_s25  ;;  %1092 = vrot.lane.b32.xlu0 %v1076_v10, %s1124_s25  ;;  %v744_v10 = vld [vmem:[%s1364_s8] sm:$0xff] }
 0x411   : > { %v1073_v6 = vpop.permute.xlu1 %1072 }
 0x412   : > { %v1075_v30 = vunpack.i.h.bf16 %v1073_v6  ;;  %v1074_v31 = vunpack.i.l.bf16 %v1073_v6 }
 0x414   : > { %v951_v32 = vpack.c.bf16 %v1075_v30, %v1074_v31 }
 0x415   : > { %v1078_v33 = vpop.permute.xlu1 %1077 }
 0x416   : > { %v1080_v34 = vunpack.i.h.bf16 %v1078_v33  ;;  %v1079_v35 = vunpack.i.l.bf16 %v1078_v33  ;;  %952 = vmatpush1.bf16.msk.msra.mxu1 %vm1220_vm5, %v951_v32 }
 0x417   : > { %648 = vmatprep.subr.bf16.mxu1 %v1128_v36 }
 0x418   : > { %v956_v37 = vpack.c.bf16 %v1080_v34, %v1079_v35 }
 0x419   : > { %v1083_v38 = vpop.permute.xlu0 %1082  ;;  %v1088_v42 = vpop.permute.xlu1 %1087 }
 0x41a   : > { %v1085_v39 = vunpack.i.h.bf16 %v1083_v38  ;;  %v1084_v40 = vunpack.i.l.bf16 %v1083_v38  ;;  %957 = vmatpush1.bf16.msk.msra.mxu1 %vm1220_vm5, %v956_v37  ;;  %v1090_v43 = vunpack.i.h.bf16 %v1088_v42  ;;  %v1089_v44 = vunpack.i.l.bf16 %v1088_v42 }
 0x41b   : > { %650 = vmatprep.subr.bf16.mxu1 %v1128_v36 }
 0x41c   : > { %v961_v41 = vpack.c.bf16 %v1085_v39, %v1084_v40  ;;  %v964_v46 = vpack.c.bf16 %v1090_v43, %v1089_v44 }
 0x41d   : > { %v1093_v45 = vpop.permute.xlu0 %1092  ;;  %v1098_v14 = vpop.permute.xlu1 %1097 }
 0x41e   : > { %962 = vmatpush1.bf16.msk.msra.mxu1 %vm1220_vm5, %v961_v41  ;;  %v1095_v47 = vunpack.i.h.bf16 %v1093_v45  ;;  %v1094_v48 = vunpack.i.l.bf16 %v1093_v45  ;;  %v1100_v50 = vunpack.i.h.bf16 %v1098_v14  ;;  %v1099_v51 = vunpack.i.l.bf16 %v1098_v14 }
 0x41f   : > { %652 = vmatprep.subr.bf16.mxu1 %v1128_v36 }
 0x420   : > { %v967_v49 = vpack.c.bf16 %v1095_v47, %v1094_v48  ;;  %v970_v52 = vpack.c.bf16 %v1100_v50, %v1099_v51 }
 0x422   : > { %653 = vmatpush1.bf16.msra.mxu1 %v627_v21  ;;  %v751_v21 = vld [vmem:[%s1364_s8 + $0x38] sm:$0xff] }
 0x423   : > { %654 = vmatprep.subr.bf16.mxu1 %v1128_v36  ;;  %v1039_v22 = vpack.c.bf16 %v751_v21, %v750_v20 }
 0x426   : > { %655 = vmatpush1.bf16.msra.mxu1 %v628_v11  ;;  %v745_v11 = vld [vmem:[%s1364_s8 + $0x8] sm:$0xff] }
 0x427   : > { %656 = vmatprep.subr.bf16.mxu1 %v1128_v36  ;;  %v1027_v12 = vpack.c.bf16 %v745_v11, %v744_v10 }
 0x429   : > { %1028 = vmatprep.subr.bf16.mxu0 %v1027_v12 }
 0x42a   : > { %657 = vmatpush1.bf16.msra.mxu1 %v629_v29  ;;  %1030 = vmatpush3.bf16.msra.mxu0 %v1027_v12 }
 0x42b   : > { %658 = vmatprep.subr.bf16.mxu1 %v1128_v36  ;;  %1032 = vmatprep.subr.bf16.mxu0 %v1031_v16 }
 0x42e   : > { %965 = vmatpush1.bf16.msk.msra.mxu1 %vm1226_vm9, %v964_v46  ;;  %1034 = vmatpush3.bf16.msra.mxu0 %v1031_v16 }
 0x42f   : > { %660 = vmatprep.subr.bf16.mxu1 %v1128_v36  ;;  %1036 = vmatprep.subr.bf16.mxu0 %v1035_v19 }
 0x432   : > { %968 = vmatpush1.bf16.msk.msra.mxu1 %vm1226_vm9, %v967_v49  ;;  %1038 = vmatpush3.bf16.msra.mxu0 %v1035_v19 }
 0x433   : > { %662 = vmatprep.subr.bf16.mxu1 %v1128_v36  ;;  %v546_v36 = vld [vmem:[%s1361_s5] sm:$0xff]  ;;  %1040 = vmatprep.subr.bf16.mxu0 %v1039_v22 }
 0x436   : > { %971 = vmatpush1.bf16.msk.msra.mxu1 %vm1226_vm9, %v970_v52  ;;  %1042 = vmatpush3.bf16.msra.mxu0 %v1039_v22 }
 0x439   : > { %679 = vmatmul.mubr.bf16.vlgmr.msra.gmra.mrb[0].mxu1 %v1102_v53 }
 0x50c   : > { %v680_v54 = vpop.f32.mrb[0].mxu1 }
 0x50d   : > { %v682_v55 = vpop.f32.mrb[1].mxu1  ;;  %v687_v56 = vsel %vm486_vm12, %v680_v54, 0.0 }
 0x50e   : > { %688 = vadd.xlane.f32.xlu0 %v687_v56  ;;  %v683_v57 = vpop.f32.mrb[2].mxu1 }
 0x50f   : > { %v685_v58 = vpop.f32.mrb[3].mxu1  ;;  %v690_v59 = vsel %vm486_vm12, %v683_v57, 0.0 }
 0x510   : > { %691 = vadd.xlane.f32.xlu1 %v690_v59 }
 0x521   : > { %715 = vperm.xlu1 %1069, %v546_v36  }
 0x525   : > { %727 = vperm.xlu1 %1069, %v548_v24  }
 0x529   : > { %732 = vperm.xlu1 %1069, %v549_v60  }
 0x59b   : > { %v689_v61 = vpop.xlane.xlu0 %688 }
 0x59c   : > { %v693_v62 = vmul.f32 0.015625, %v689_v61 }
 0x59d   : > { %v692_v63 = vpop.xlane.xlu1 %691 }
 0x59e   : > { %v695_v0 = vsub.f32 %v680_v54, %v693_v62  ;;  %v694_v1 = vmul.f32 0.015625, %v692_v63 }
 0x5a0   : > { %v696_v3 = vsub.f32 %v683_v57, %v694_v1  ;;  %v697_v4 = vmul.f32 %v695_v0, %v695_v0 }
 0x5a1   : > { %v716_v2 = vpop.permute.xlu1 %715 }
 0x5a2   : > { %v699_v5 = vsel %vm486_vm12, %v697_v4, 0.0  ;;  %v698_v7 = vmul.f32 %v696_v3, %v696_v3 }
 0x5a3   : > { %700 = vadd.xlane.f32.xlu0 %v699_v5 }
 0x5a4   : > { %v702_v8 = vsel %vm486_vm12, %v698_v7, 0.0 }
 0x5a5   : > { %v728_v31 = vpop.permute.xlu1 %727 }
 0x5a7   : > { %703 = vadd.xlane.f32.xlu0 %v702_v8 }
 0x5a9   : > { %v733_v40 = vpop.permute.xlu1 %732 }
 0x5bd   : > { %720 = vperm.xlu0 %1070, %v547_v9  }
 0x630   : > { %v701_v23 = vpop.xlane.xlu0 %700 }
 0x631   : > { %v705_v25 = vmul.f32 0.015625, %v701_v23 }
 0x633   : > { %v707_v26 = vadd.f32 1e-05, %v705_v25 }
 0x634   : > { %v704_v27 = vpop.xlane.xlu0 %703 }
 0x635   : > { %1109 = vrsqrt.f32 %v707_v26  ;;  %v706_v28 = vmul.f32 0.015625, %v704_v27 }
 0x637   : > { %v708_v29 = vadd.f32 1e-05, %v706_v28 }
 0x639   : > { %1111 = vrsqrt.f32 %v708_v29 }
 0x63c   : > { %v721_v37 = vpop.permute.xlu0 %720 }
 0x63f   : > { %v1110_v6 = vpop.eup %1109 }
 0x640   : > { %v711_v30 = vmul.f32 %v1110_v6, %v695_v0 }
 0x642   : > { %v723_v32 = vmul.f32 %v716_v2, %v711_v30 }
 0x643   : > { %v1112_v33 = vpop.eup %1111 }
 0x644   : > { %v712_v34 = vmul.f32 %v1112_v33, %v696_v3  ;;  %v735_v35 = vadd.f32 %v728_v31, %v723_v32 }
 0x646   : > { %v724_v38 = vmul.f32 %v721_v37, %v712_v34  ;;  %vm737_vm0 = vcmp.ge.f32.partialorder %v735_v35, 0.0  ;;  %v739_v39 = vmul.f32 0.01, %v735_v35 }
 0x648   : > { %v736_v41 = vadd.f32 %v733_v40, %v724_v38  ;;  %v741_v42 = vsel %vm737_vm0, %v735_v35, %v739_v39 }
 0x649   : > { %743 = vst.msk [vmem:[%s362_s16] sm:$0xff] %vm486_vm12, %v741_v42  ;;  %1024 = vmatprep.mubr.msk.f32.mxu0 %vm486_vm12, %v741_v42 }
 0x64a   : > { %vm738_vm1 = vcmp.ge.f32.partialorder %v736_v41, 0.0  ;;  %v740_v43 = vmul.f32 0.01, %v736_v41 }
 0x64c   : > { %v742_v44 = vsel %vm738_vm1, %v736_v41, %v740_v43 }
 0x64d   : > { %1025 = vmatmul.mubr.msk.f32.vlgmr.msra.gmra.mrb[4].mxu0 %vm486_vm12, %v742_v44 }
 0x720   : > { %v1026_v45 = vpop.f32.mrb[4].mxu0 }
 0x721   : > { %834 = vst.msk [vmem:[%s367_s19 + $0x8] sm:$0xff] %vm642_vm15, %v1026_v45  ;;  %v824_v46 = vpop.f32.mrb[5].mxu0 }
 0x722   : > { %833 = vst.msk [vmem:[%s367_s19] sm:$0xff] %vm642_vm15, %v824_v46 }
 0x723 PF: > { %s21_s13 = sadd.s32 1, %s1119_s13  }
 0x724   : > { %p18_p4 = scmp.ge.s32.totalorder %s21_s13, 4  }
 0x726   :  { %20 = sbr.rel (!%p18_p4) target bundleno = 1 (0x1), region = 98 }

</bundles_post_ra>
